<compile_context>
chip_gen: v6e
topology: v6e:2x2x1
jax: 0.10.0
libtpu: 0.0.40
codegen_flags: <defaults>
</compile_context>

<pallas_src>
import functools

import jax
import jax.numpy as jnp
from jax.experimental import pallas as pl
from jax.experimental.pallas import tpu as pltpu

EPS = 1e-5
_TM_MAX = 1024                        # M-tile width (lanes), multiple of 128
_VMEM_LIMIT = 32 * 1024 * 1024        # explicit scoped-VMEM budget (all gens)

_FULL_VMEM = pl.BlockSpec(memory_space=pltpu.MemorySpace.VMEM)


# ----------------------------------------------------------------------------
# Pallas kernels
# ----------------------------------------------------------------------------
def _conv_kernel(x_ref, w_ref, b_ref, o_ref, *, relu):
    """GEMM conv + folded-BN bias (+ReLU), channel-major output.

    x_ref: (K, tm)   im2col patches tile (K = Cin*kh*kw, tm on lanes)
    w_ref: (Cout, K) BN-scale-folded weight
    b_ref: (Cout, 1) folded BN bias
    o_ref: (Cout, tm)
    """
    acc = jnp.dot(w_ref[...], x_ref[...], preferred_element_type=jnp.float32)
    acc = acc + b_ref[...]
    if relu:
        acc = jnp.maximum(acc, 0.0)
    o_ref[...] = acc


def _conv_res_kernel(x_ref, w_ref, b_ref, r_ref, o_ref, *, relu):
    """Same as _conv_kernel plus a residual add.  r_ref: (Cout, tm)."""
    acc = jnp.dot(w_ref[...], x_ref[...], preferred_element_type=jnp.float32)
    acc = acc + b_ref[...] + r_ref[...]
    if relu:
        acc = jnp.maximum(acc, 0.0)
    o_ref[...] = acc


def _head_kernel(x_ref, w_ref, b_ref, o_ref):
    """Global average pool over H*W followed by the final Linear layer.

    x_ref: (C, N, H*W)  w_ref: (num_classes, C)  b_ref: (num_classes, 1)
    o_ref: (num_classes, N)
    """
    pooled = jnp.mean(x_ref[...], axis=2)                       # (C, N)
    o_ref[...] = (jnp.dot(w_ref[...], pooled,
                          preferred_element_type=jnp.float32) + b_ref[...])


# ----------------------------------------------------------------------------
# JAX glue
# ----------------------------------------------------------------------------
def _fold_bn(bn):
    scale = bn["gamma"] / jnp.sqrt(bn["var"] + EPS)
    bias = bn["beta"] - bn["mean"] * scale
    return scale, bias


def _im2col_t(x_cnhw, ksize=3, stride=1, padding=1):
    """Channel-major im2col: (C,N,H,W) -> ((C*k*k, N*Ho*Wo), (N, Ho, Wo)).

    K ordering is (Cin, kh, kw) so the PyTorch weight (Cout, Cin, kh, kw)
    reshapes to (Cout, K) with no transpose.
    """
    # TODO(synk): the 9x-duplicated patches array is still materialized by XLA
    # in HBM; a fully in-kernel patch extraction would need halo'd spatial
    # tiles and strided in-VMEM slicing, which is left out for robustness.
    C, N, H, W = x_cnhw.shape
    xp = jnp.pad(x_cnhw, ((0, 0), (0, 0), (padding, padding), (padding, padding)))
    Ho = (H + 2 * padding - ksize) // stride + 1
    Wo = (W + 2 * padding - ksize) // stride + 1
    patches = []
    for dh in range(ksize):
        for dw in range(ksize):
            patches.append(xp[:, :, dh:dh + stride * Ho:stride,
                              dw:dw + stride * Wo:stride])
    p = jnp.stack(patches, axis=1)                   # (C, k*k, N, Ho, Wo)
    return p.reshape(C * ksize * ksize, N * Ho * Wo), (N, Ho, Wo)


def _conv_gemm(patches_t, w_scaled, bias_col, residual=None, relu=True):
    """Tiled Pallas GEMM with fused BN-bias / residual / ReLU epilogue."""
    K, M = patches_t.shape
    cout = w_scaled.shape[0]
    tm = M if M <= _TM_MAX else _TM_MAX              # full dim if small, else 1024
    n_tiles = pl.cdiv(M, tm)
    Mp = n_tiles * tm
    if Mp != M:                                      # pad M to a tile multiple
        patches_t = jnp.pad(patches_t, ((0, 0), (0, Mp - M)))
        if residual is not None:
            residual = jnp.pad(residual, ((0, 0), (0, Mp - M)))

    in_specs = [
        pl.BlockSpec((K, tm), lambda i: (0, i)),      # patches tile (pipelined)
        pl.BlockSpec((cout, K), lambda i: (0, 0)),    # weight (grid-resident)
        pl.BlockSpec((cout, 1), lambda i: (0, 0)),    # bias   (grid-resident)
    ]
    args = [patches_t, w_scaled, bias_col]
    if residual is None:
        kern = functools.partial(_conv_kernel, relu=relu)
    else:
        in_specs.append(pl.BlockSpec((cout, tm), lambda i: (0, i)))
        args.append(residual)
        kern = functools.partial(_conv_res_kernel, relu=relu)

    out = pl.pallas_call(
        kern,
        out_shape=jax.ShapeDtypeStruct((cout, Mp), jnp.float32),
        grid=(n_tiles,),
        in_specs=in_specs,
        out_specs=pl.BlockSpec((cout, tm), lambda i: (0, i)),
        compiler_params=pltpu.CompilerParams(
            dimension_semantics=("parallel",),
            vmem_limit_bytes=_VMEM_LIMIT),
    )(*args)
    return out if Mp == M else out[:, :M]


def conv_bn_act(x_cnhw, w_oikk, bn, *, stride, residual=None, relu=True):
    """conv3x3(stride, pad=1, no bias) + BN(eval) + optional residual + ReLU."""
    scale, bias = _fold_bn(bn)
    cout = w_oikk.shape[0]
    patches_t, (N, Ho, Wo) = _im2col_t(x_cnhw, ksize=3, stride=stride, padding=1)
    # (Cout, Cin, kh, kw) -> (Cout, K); BN scale folded into the weight.
    w_mat = w_oikk.reshape(cout, -1) * scale[:, None]
    out = _conv_gemm(patches_t, w_mat, bias.reshape(cout, 1),
                     residual=residual, relu=relu)
    return out.reshape(cout, N, Ho, Wo)


def basic_block(x_cnhw, blk):
    stride, in_planes, planes = blk["stride"], blk["in_planes"], blk["planes"]
    # option-A shortcut: stride-2 spatial subsample + zero-pad channels
    if stride != 1 or in_planes != planes:
        sc = x_cnhw[:, :, ::2, ::2]
        pad = planes // 4
        sc = jnp.pad(sc, ((pad, pad), (0, 0), (0, 0), (0, 0)))
    else:
        sc = x_cnhw
    out = conv_bn_act(x_cnhw, blk["conv1"], blk["bn1"], stride=stride, relu=True)
    res = sc.reshape(planes, -1)                     # (planes, N*Ho*Wo)
    out = conv_bn_act(out, blk["conv2"], blk["bn2"], stride=1,
                      residual=res, relu=True)
    return out


def cfresnet_forward(params, x_nchw):
    # NCHW -> channel-major CNHW (single transpose at entry).
    x = jnp.transpose(x_nchw, (1, 0, 2, 3)).astype(jnp.float32)
    out = conv_bn_act(x, params["conv1"], params["bn1"], stride=2, relu=True)
    for li in (1, 2, 3):
        for blk in params[f"layer{li}"]:
            out = basic_block(out, blk)
    C, N, H, W = out.shape
    assert H == W, "avg_pool2d(out, out.size()[3]) pools the full map only if H == W"
    num_classes = params["fc_w"].shape[0]
    logits_t = pl.pallas_call(
        _head_kernel,
        out_shape=jax.ShapeDtypeStruct((num_classes, N), jnp.float32),
        in_specs=[_FULL_VMEM] * 3,
        out_specs=_FULL_VMEM,
    )(out.reshape(C, N, H * W), params["fc_w"],
      params["fc_b"].reshape(num_classes, 1))
    return logits_t.T                                # (N, num_classes)


# ----------------------------------------------------------------------------
# deterministic parameter init (matches __init__ shapes; kaiming_normal_ fan_in)
# ----------------------------------------------------------------------------
def _kaiming_conv(key, cout, cin, k):
    std = (2.0 / (cin * k * k)) ** 0.5
    return jax.random.normal(key, (cout, cin, k, k), jnp.float32) * std


def _bn_params(c):
    return dict(gamma=jnp.ones((c,), jnp.float32), beta=jnp.zeros((c,), jnp.float32),
                mean=jnp.zeros((c,), jnp.float32), var=jnp.ones((c,), jnp.float32))


def init_params(key, num_blocks=(1, 1, 1), num_classes=10):
    keys = iter(jax.random.split(key, 64))
    params = {"conv1": _kaiming_conv(next(keys), 16, 3, 3), "bn1": _bn_params(16)}
    in_planes = 16
    for li, (planes, nb, stride0) in enumerate(zip((16, 32, 64), num_blocks, (1, 2, 2)), 1):
        blocks = []
        for s in [stride0] + [1] * (nb - 1):
            blocks.append(dict(
                conv1=_kaiming_conv(next(keys), planes, in_planes, 3),
                bn1=_bn_params(planes),
                conv2=_kaiming_conv(next(keys), planes, planes, 3),
                bn2=_bn_params(planes),
                stride=s, in_planes=in_planes, planes=planes))
            in_planes = planes
        params[f"layer{li}"] = blocks
    fan_in = 64
    params["fc_w"] = jax.random.normal(next(keys), (num_classes, 64), jnp.float32) * (2.0 / fan_in) ** 0.5
    bound = 1.0 / fan_in ** 0.5
    params["fc_b"] = jax.random.uniform(next(keys), (num_classes,), jnp.float32,
                                        minval=-bound, maxval=bound)
    return params


if __name__ == "__main__":
    key = jax.random.PRNGKey(0)
    pkey, xkey = jax.random.split(key)
    params = init_params(pkey, num_blocks=(1, 1, 1), num_classes=10)
    # small CIFAR-like input: (batch=2, channels=3, 16x16)
    x = jax.random.normal(xkey, (2, 3, 16, 16), jnp.float32)
    fwd = jax.jit(lambda inp: cfresnet_forward(params, inp))
    logits = fwd(x)
    jax.block_until_ready(logits)
    assert logits.shape == (2, 10) and logits.dtype == jnp.float32
    print("KERNEL_OK")
</pallas_src>

<mosaic_0001>
module attributes {stable_mosaic.version = 11 : i64} {
  func.func @_conv_kernel(%arg0: i32, %arg1: memref<27x128xf32, #tpu.memory_space<vmem>>, %arg2: memref<16x27xf32, #tpu.memory_space<vmem>>, %arg3: memref<16x1xf32, #tpu.memory_space<vmem>>, %arg4: memref<16x128xf32, #tpu.memory_space<vmem>>) attributes {dimension_semantics = [#tpu.dimension_semantics<parallel>], iteration_bounds = array<i64: 1>, scalar_prefetch = 0 : i64, scratch_operands = 0 : i64, tpu.core_type = #tpu.core_type<tc>, window_params = [{transform_indices = @transform_0, window_bounds = array<i64: 27, 128>}, {pipeline_mode = #tpu.pipeline_mode<synchronous>, transform_indices = @transform_1, window_bounds = array<i64: 16, 27>}, {pipeline_mode = #tpu.pipeline_mode<synchronous>, transform_indices = @transform_2, window_bounds = array<i64: 16, 1>}, {transform_indices = @transform_3, window_bounds = array<i64: 16, 128>}]} {
    %c0 = arith.constant 0 : index
    %c0_0 = arith.constant 0 : index
    %0 = vector.load %arg2[%c0, %c0_0] : memref<16x27xf32, #tpu.memory_space<vmem>>, vector<16x27xf32>
    %c0_1 = arith.constant 0 : index
    %c0_2 = arith.constant 0 : index
    %1 = vector.load %arg1[%c0_1, %c0_2] : memref<27x128xf32, #tpu.memory_space<vmem>>, vector<27x128xf32>
    %cst = arith.constant dense<0.000000e+00> : vector<16x128xf32>
    %2 = tpu.matmul %0, %1, %cst {dimension_numbers = #tpu.dot_dimension_numbers<[1], [0], [0], [1], [0, 0, 1, 1], [], []>} : vector<16x27xf32>, vector<27x128xf32>, vector<16x128xf32> -> vector<16x128xf32>
    %c0_3 = arith.constant 0 : index
    %c0_4 = arith.constant 0 : index
    %3 = vector.load %arg3[%c0_3, %c0_4] : memref<16x1xf32, #tpu.memory_space<vmem>>, vector<16x1xf32>
    %4 = vector.broadcast %3 : vector<16x1xf32> to vector<16x128xf32>
    %5 = arith.addf %2, %4 : vector<16x128xf32>
    %cst_5 = arith.constant 0.000000e+00 : f32
    %6 = vector.broadcast %cst_5 : f32 to vector<16x128xf32>
    %7 = arith.maximumf %5, %6 : vector<16x128xf32>
    %c0_6 = arith.constant 0 : index
    %c0_7 = arith.constant 0 : index
    %8 = vector.load %arg4[%c0_6, %c0_7] : memref<16x128xf32, #tpu.memory_space<vmem>>, vector<16x128xf32>
    tpu.vector_store %arg4[%c0_6, %c0_7], %7 {strides = array<i32>} : memref<16x128xf32, #tpu.memory_space<vmem>>, vector<16x128xf32>,
    return
  }
  func.func @transform_0(%arg0: i32) -> (i32, i32) {
    %c0_i32 = arith.constant 0 : i32
    %c0_i32_0 = arith.constant 0 : i32
    return %c0_i32, %arg0 : i32, i32
  }
  func.func @transform_1(%arg0: i32) -> (i32, i32) {
    %c0_i32 = arith.constant 0 : i32
    %c0_i32_0 = arith.constant 0 : i32
    %c0_i32_1 = arith.constant 0 : i32
    return %c0_i32, %c0_i32_0 : i32, i32
  }
  func.func @transform_2(%arg0: i32) -> (i32, i32) {
    %c0_i32 = arith.constant 0 : i32
    %c0_i32_0 = arith.constant 0 : i32
    %c0_i32_1 = arith.constant 0 : i32
    return %c0_i32, %c0_i32_0 : i32, i32
  }
  func.func @transform_3(%arg0: i32) -> (i32, i32) {
    %c0_i32 = arith.constant 0 : i32
    %c0_i32_0 = arith.constant 0 : i32
    return %c0_i32, %arg0 : i32, i32
  }
}

module attributes {stable_mosaic.version = 11 : i64} {
  func.func @_conv_kernel(%arg0: i32, %arg1: memref<144x128xf32, #tpu.memory_space<vmem>>, %arg2: memref<16x144xf32, #tpu.memory_space<vmem>>, %arg3: memref<16x1xf32, #tpu.memory_space<vmem>>, %arg4: memref<16x128xf32, #tpu.memory_space<vmem>>) attributes {dimension_semantics = [#tpu.dimension_semantics<parallel>], iteration_bounds = array<i64: 1>, scalar_prefetch = 0 : i64, scratch_operands = 0 : i64, tpu.core_type = #tpu.core_type<tc>, window_params = [{transform_indices = @transform_0, window_bounds = array<i64: 144, 128>}, {pipeline_mode = #tpu.pipeline_mode<synchronous>, transform_indices = @transform_1, window_bounds = array<i64: 16, 144>}, {pipeline_mode = #tpu.pipeline_mode<synchronous>, transform_indices = @transform_2, window_bounds = array<i64: 16, 1>}, {transform_indices = @transform_3, window_bounds = array<i64: 16, 128>}]} {
    %c0 = arith.constant 0 : index
    %c0_0 = arith.constant 0 : index
    %0 = vector.load %arg2[%c0, %c0_0] : memref<16x144xf32, #tpu.memory_space<vmem>>, vector<16x144xf32>
    %c0_1 = arith.constant 0 : index
    %c0_2 = arith.constant 0 : index
    %1 = vector.load %arg1[%c0_1, %c0_2] : memref<144x128xf32, #tpu.memory_space<vmem>>, vector<144x128xf32>
    %cst = arith.constant dense<0.000000e+00> : vector<16x128xf32>
    %2 = tpu.matmul %0, %1, %cst {dimension_numbers = #tpu.dot_dimension_numbers<[1], [0], [0], [1], [0, 0, 1, 1], [], []>} : vector<16x144xf32>, vector<144x128xf32>, vector<16x128xf32> -> vector<16x128xf32>
    %c0_3 = arith.constant 0 : index
    %c0_4 = arith.constant 0 : index
    %3 = vector.load %arg3[%c0_3, %c0_4] : memref<16x1xf32, #tpu.memory_space<vmem>>, vector<16x1xf32>
    %4 = vector.broadcast %3 : vector<16x1xf32> to vector<16x128xf32>
    %5 = arith.addf %2, %4 : vector<16x128xf32>
    %cst_5 = arith.constant 0.000000e+00 : f32
    %6 = vector.broadcast %cst_5 : f32 to vector<16x128xf32>
    %7 = arith.maximumf %5, %6 : vector<16x128xf32>
    %c0_6 = arith.constant 0 : index
    %c0_7 = arith.constant 0 : index
    %8 = vector.load %arg4[%c0_6, %c0_7] : memref<16x128xf32, #tpu.memory_space<vmem>>, vector<16x128xf32>
    tpu.vector_store %arg4[%c0_6, %c0_7], %7 {strides = array<i32>} : memref<16x128xf32, #tpu.memory_space<vmem>>, vector<16x128xf32>,
    return
  }
  func.func @transform_0(%arg0: i32) -> (i32, i32) {
    %c0_i32 = arith.constant 0 : i32
    %c0_i32_0 = arith.constant 0 : i32
    return %c0_i32, %arg0 : i32, i32
  }
  func.func @transform_1(%arg0: i32) -> (i32, i32) {
    %c0_i32 = arith.constant 0 : i32
    %c0_i32_0 = arith.constant 0 : i32
    %c0_i32_1 = arith.constant 0 : i32
    return %c0_i32, %c0_i32_0 : i32, i32
  }
  func.func @transform_2(%arg0: i32) -> (i32, i32) {
    %c0_i32 = arith.constant 0 : i32
    %c0_i32_0 = arith.constant 0 : i32
    %c0_i32_1 = arith.constant 0 : i32
    return %c0_i32, %c0_i32_0 : i32, i32
  }
  func.func @transform_3(%arg0: i32) -> (i32, i32) {
    %c0_i32 = arith.constant 0 : i32
    %c0_i32_0 = arith.constant 0 : i32
    return %c0_i32, %arg0 : i32, i32
  }
}

module attributes {stable_mosaic.version = 11 : i64} {
  func.func @_conv_res_kernel(%arg0: i32, %arg1: memref<144x128xf32, #tpu.memory_space<vmem>>, %arg2: memref<16x144xf32, #tpu.memory_space<vmem>>, %arg3: memref<16x1xf32, #tpu.memory_space<vmem>>, %arg4: memref<16x128xf32, #tpu.memory_space<vmem>>, %arg5: memref<16x128xf32, #tpu.memory_space<vmem>>) attributes {dimension_semantics = [#tpu.dimension_semantics<parallel>], iteration_bounds = array<i64: 1>, scalar_prefetch = 0 : i64, scratch_operands = 0 : i64, tpu.core_type = #tpu.core_type<tc>, window_params = [{transform_indices = @transform_0, window_bounds = array<i64: 144, 128>}, {pipeline_mode = #tpu.pipeline_mode<synchronous>, transform_indices = @transform_1, window_bounds = array<i64: 16, 144>}, {pipeline_mode = #tpu.pipeline_mode<synchronous>, transform_indices = @transform_2, window_bounds = array<i64: 16, 1>}, {transform_indices = @transform_3, window_bounds = array<i64: 16, 128>}, {transform_indices = @transform_4, window_bounds = array<i64: 16, 128>}]} {
    %c0 = arith.constant 0 : index
    %c0_0 = arith.constant 0 : index
    %0 = vector.load %arg2[%c0, %c0_0] : memref<16x144xf32, #tpu.memory_space<vmem>>, vector<16x144xf32>
    %c0_1 = arith.constant 0 : index
    %c0_2 = arith.constant 0 : index
    %1 = vector.load %arg1[%c0_1, %c0_2] : memref<144x128xf32, #tpu.memory_space<vmem>>, vector<144x128xf32>
    %cst = arith.constant dense<0.000000e+00> : vector<16x128xf32>
    %2 = tpu.matmul %0, %1, %cst {dimension_numbers = #tpu.dot_dimension_numbers<[1], [0], [0], [1], [0, 0, 1, 1], [], []>} : vector<16x144xf32>, vector<144x128xf32>, vector<16x128xf32> -> vector<16x128xf32>
    %c0_3 = arith.constant 0 : index
    %c0_4 = arith.constant 0 : index
    %3 = vector.load %arg3[%c0_3, %c0_4] : memref<16x1xf32, #tpu.memory_space<vmem>>, vector<16x1xf32>
    %4 = vector.broadcast %3 : vector<16x1xf32> to vector<16x128xf32>
    %5 = arith.addf %2, %4 : vector<16x128xf32>
    %c0_5 = arith.constant 0 : index
    %c0_6 = arith.constant 0 : index
    %6 = vector.load %arg4[%c0_5, %c0_6] : memref<16x128xf32, #tpu.memory_space<vmem>>, vector<16x128xf32>
    %7 = arith.addf %5, %6 : vector<16x128xf32>
    %cst_7 = arith.constant 0.000000e+00 : f32
    %8 = vector.broadcast %cst_7 : f32 to vector<16x128xf32>
    %9 = arith.maximumf %7, %8 : vector<16x128xf32>
    %c0_8 = arith.constant 0 : index
    %c0_9 = arith.constant 0 : index
    %10 = vector.load %arg5[%c0_8, %c0_9] : memref<16x128xf32, #tpu.memory_space<vmem>>, vector<16x128xf32>
    tpu.vector_store %arg5[%c0_8, %c0_9], %9 {strides = array<i32>} : memref<16x128xf32, #tpu.memory_space<vmem>>, vector<16x128xf32>,
    return
  }
  func.func @transform_0(%arg0: i32) -> (i32, i32) {
    %c0_i32 = arith.constant 0 : i32
    %c0_i32_0 = arith.constant 0 : i32
    return %c0_i32, %arg0 : i32, i32
  }
  func.func @transform_1(%arg0: i32) -> (i32, i32) {
    %c0_i32 = arith.constant 0 : i32
    %c0_i32_0 = arith.constant 0 : i32
    %c0_i32_1 = arith.constant 0 : i32
    return %c0_i32, %c0_i32_0 : i32, i32
  }
  func.func @transform_2(%arg0: i32) -> (i32, i32) {
    %c0_i32 = arith.constant 0 : i32
    %c0_i32_0 = arith.constant 0 : i32
    %c0_i32_1 = arith.constant 0 : i32
    return %c0_i32, %c0_i32_0 : i32, i32
  }
  func.func @transform_3(%arg0: i32) -> (i32, i32) {
    %c0_i32 = arith.constant 0 : i32
    %c0_i32_0 = arith.constant 0 : i32
    return %c0_i32, %arg0 : i32, i32
  }
  func.func @transform_4(%arg0: i32) -> (i32, i32) {
    %c0_i32 = arith.constant 0 : i32
    %c0_i32_0 = arith.constant 0 : i32
    return %c0_i32, %arg0 : i32, i32
  }
}

module attributes {stable_mosaic.version = 11 : i64} {
  func.func @_conv_kernel(%arg0: i32, %arg1: memref<144x32xf32, #tpu.memory_space<vmem>>, %arg2: memref<32x144xf32, #tpu.memory_space<vmem>>, %arg3: memref<32x1xf32, #tpu.memory_space<vmem>>, %arg4: memref<32x32xf32, #tpu.memory_space<vmem>>) attributes {dimension_semantics = [#tpu.dimension_semantics<parallel>], iteration_bounds = array<i64: 1>, scalar_prefetch = 0 : i64, scratch_operands = 0 : i64, tpu.core_type = #tpu.core_type<tc>, window_params = [{transform_indices = @transform_0, window_bounds = array<i64: 144, 32>}, {pipeline_mode = #tpu.pipeline_mode<synchronous>, transform_indices = @transform_1, window_bounds = array<i64: 32, 144>}, {pipeline_mode = #tpu.pipeline_mode<synchronous>, transform_indices = @transform_2, window_bounds = array<i64: 32, 1>}, {transform_indices = @transform_3, window_bounds = array<i64: 32, 32>}]} {
    %c0 = arith.constant 0 : index
    %c0_0 = arith.constant 0 : index
    %0 = vector.load %arg2[%c0, %c0_0] : memref<32x144xf32, #tpu.memory_space<vmem>>, vector<32x144xf32>
    %c0_1 = arith.constant 0 : index
    %c0_2 = arith.constant 0 : index
    %1 = vector.load %arg1[%c0_1, %c0_2] : memref<144x32xf32, #tpu.memory_space<vmem>>, vector<144x32xf32>
    %cst = arith.constant dense<0.000000e+00> : vector<32x32xf32>
    %2 = tpu.matmul %0, %1, %cst {dimension_numbers = #tpu.dot_dimension_numbers<[1], [0], [0], [1], [0, 0, 1, 1], [], []>} : vector<32x144xf32>, vector<144x32xf32>, vector<32x32xf32> -> vector<32x32xf32>
    %c0_3 = arith.constant 0 : index
    %c0_4 = arith.constant 0 : index
    %3 = vector.load %arg3[%c0_3, %c0_4] : memref<32x1xf32, #tpu.memory_space<vmem>>, vector<32x1xf32>
    %4 = vector.broadcast %3 : vector<32x1xf32> to vector<32x32xf32>
    %5 = arith.addf %2, %4 : vector<32x32xf32>
    %cst_5 = arith.constant 0.000000e+00 : f32
    %6 = vector.broadcast %cst_5 : f32 to vector<32x32xf32>
    %7 = arith.maximumf %5, %6 : vector<32x32xf32>
    %c0_6 = arith.constant 0 : index
    %c0_7 = arith.constant 0 : index
    %8 = vector.load %arg4[%c0_6, %c0_7] : memref<32x32xf32, #tpu.memory_space<vmem>>, vector<32x32xf32>
    tpu.vector_store %arg4[%c0_6, %c0_7], %7 {strides = array<i32>} : memref<32x32xf32, #tpu.memory_space<vmem>>, vector<32x32xf32>,
    return
  }
  func.func @transform_0(%arg0: i32) -> (i32, i32) {
    %c0_i32 = arith.constant 0 : i32
    %c0_i32_0 = arith.constant 0 : i32
    return %c0_i32, %arg0 : i32, i32
  }
  func.func @transform_1(%arg0: i32) -> (i32, i32) {
    %c0_i32 = arith.constant 0 : i32
    %c0_i32_0 = arith.constant 0 : i32
    %c0_i32_1 = arith.constant 0 : i32
    return %c0_i32, %c0_i32_0 : i32, i32
  }
  func.func @transform_2(%arg0: i32) -> (i32, i32) {
    %c0_i32 = arith.constant 0 : i32
    %c0_i32_0 = arith.constant 0 : i32
    %c0_i32_1 = arith.constant 0 : i32
    return %c0_i32, %c0_i32_0 : i32, i32
  }
  func.func @transform_3(%arg0: i32) -> (i32, i32) {
    %c0_i32 = arith.constant 0 : i32
    %c0_i32_0 = arith.constant 0 : i32
    return %c0_i32, %arg0 : i32, i32
  }
}

module attributes {stable_mosaic.version = 11 : i64} {
  func.func @_conv_res_kernel(%arg0: i32, %arg1: memref<288x32xf32, #tpu.memory_space<vmem>>, %arg2: memref<32x288xf32, #tpu.memory_space<vmem>>, %arg3: memref<32x1xf32, #tpu.memory_space<vmem>>, %arg4: memref<32x32xf32, #tpu.memory_space<vmem>>, %arg5: memref<32x32xf32, #tpu.memory_space<vmem>>) attributes {dimension_semantics = [#tpu.dimension_semantics<parallel>], iteration_bounds = array<i64: 1>, scalar_prefetch = 0 : i64, scratch_operands = 0 : i64, tpu.core_type = #tpu.core_type<tc>, window_params = [{transform_indices = @transform_0, window_bounds = array<i64: 288, 32>}, {pipeline_mode = #tpu.pipeline_mode<synchronous>, transform_indices = @transform_1, window_bounds = array<i64: 32, 288>}, {pipeline_mode = #tpu.pipeline_mode<synchronous>, transform_indices = @transform_2, window_bounds = array<i64: 32, 1>}, {transform_indices = @transform_3, window_bounds = array<i64: 32, 32>}, {transform_indices = @transform_4, window_bounds = array<i64: 32, 32>}]} {
    %c0 = arith.constant 0 : index
    %c0_0 = arith.constant 0 : index
    %0 = vector.load %arg2[%c0, %c0_0] : memref<32x288xf32, #tpu.memory_space<vmem>>, vector<32x288xf32>
    %c0_1 = arith.constant 0 : index
    %c0_2 = arith.constant 0 : index
    %1 = vector.load %arg1[%c0_1, %c0_2] : memref<288x32xf32, #tpu.memory_space<vmem>>, vector<288x32xf32>
    %cst = arith.constant dense<0.000000e+00> : vector<32x32xf32>
    %2 = tpu.matmul %0, %1, %cst {dimension_numbers = #tpu.dot_dimension_numbers<[1], [0], [0], [1], [0, 0, 1, 1], [], []>} : vector<32x288xf32>, vector<288x32xf32>, vector<32x32xf32> -> vector<32x32xf32>
    %c0_3 = arith.constant 0 : index
    %c0_4 = arith.constant 0 : index
    %3 = vector.load %arg3[%c0_3, %c0_4] : memref<32x1xf32, #tpu.memory_space<vmem>>, vector<32x1xf32>
    %4 = vector.broadcast %3 : vector<32x1xf32> to vector<32x32xf32>
    %5 = arith.addf %2, %4 : vector<32x32xf32>
    %c0_5 = arith.constant 0 : index
    %c0_6 = arith.constant 0 : index
    %6 = vector.load %arg4[%c0_5, %c0_6] : memref<32x32xf32, #tpu.memory_space<vmem>>, vector<32x32xf32>
    %7 = arith.addf %5, %6 : vector<32x32xf32>
    %cst_7 = arith.constant 0.000000e+00 : f32
    %8 = vector.broadcast %cst_7 : f32 to vector<32x32xf32>
    %9 = arith.maximumf %7, %8 : vector<32x32xf32>
    %c0_8 = arith.constant 0 : index
    %c0_9 = arith.constant 0 : index
    %10 = vector.load %arg5[%c0_8, %c0_9] : memref<32x32xf32, #tpu.memory_space<vmem>>, vector<32x32xf32>
    tpu.vector_store %arg5[%c0_8, %c0_9], %9 {strides = array<i32>} : memref<32x32xf32, #tpu.memory_space<vmem>>, vector<32x32xf32>,
    return
  }
  func.func @transform_0(%arg0: i32) -> (i32, i32) {
    %c0_i32 = arith.constant 0 : i32
    %c0_i32_0 = arith.constant 0 : i32
    return %c0_i32, %arg0 : i32, i32
  }
  func.func @transform_1(%arg0: i32) -> (i32, i32) {
    %c0_i32 = arith.constant 0 : i32
    %c0_i32_0 = arith.constant 0 : i32
    %c0_i32_1 = arith.constant 0 : i32
    return %c0_i32, %c0_i32_0 : i32, i32
  }
  func.func @transform_2(%arg0: i32) -> (i32, i32) {
    %c0_i32 = arith.constant 0 : i32
    %c0_i32_0 = arith.constant 0 : i32
    %c0_i32_1 = arith.constant 0 : i32
    return %c0_i32, %c0_i32_0 : i32, i32
  }
  func.func @transform_3(%arg0: i32) -> (i32, i32) {
    %c0_i32 = arith.constant 0 : i32
    %c0_i32_0 = arith.constant 0 : i32
    return %c0_i32, %arg0 : i32, i32
  }
  func.func @transform_4(%arg0: i32) -> (i32, i32) {
    %c0_i32 = arith.constant 0 : i32
    %c0_i32_0 = arith.constant 0 : i32
    return %c0_i32, %arg0 : i32, i32
  }
}

module attributes {stable_mosaic.version = 11 : i64} {
  func.func @_conv_kernel(%arg0: i32, %arg1: memref<288x8xf32, #tpu.memory_space<vmem>>, %arg2: memref<64x288xf32, #tpu.memory_space<vmem>>, %arg3: memref<64x1xf32, #tpu.memory_space<vmem>>, %arg4: memref<64x8xf32, #tpu.memory_space<vmem>>) attributes {dimension_semantics = [#tpu.dimension_semantics<parallel>], iteration_bounds = array<i64: 1>, scalar_prefetch = 0 : i64, scratch_operands = 0 : i64, tpu.core_type = #tpu.core_type<tc>, window_params = [{transform_indices = @transform_0, window_bounds = array<i64: 288, 8>}, {pipeline_mode = #tpu.pipeline_mode<synchronous>, transform_indices = @transform_1, window_bounds = array<i64: 64, 288>}, {pipeline_mode = #tpu.pipeline_mode<synchronous>, transform_indices = @transform_2, window_bounds = array<i64: 64, 1>}, {transform_indices = @transform_3, window_bounds = array<i64: 64, 8>}]} {
    %c0 = arith.constant 0 : index
    %c0_0 = arith.constant 0 : index
    %0 = vector.load %arg2[%c0, %c0_0] : memref<64x288xf32, #tpu.memory_space<vmem>>, vector<64x288xf32>
    %c0_1 = arith.constant 0 : index
    %c0_2 = arith.constant 0 : index
    %1 = vector.load %arg1[%c0_1, %c0_2] : memref<288x8xf32, #tpu.memory_space<vmem>>, vector<288x8xf32>
    %cst = arith.constant dense<0.000000e+00> : vector<64x8xf32>
    %2 = tpu.matmul %0, %1, %cst {dimension_numbers = #tpu.dot_dimension_numbers<[1], [0], [0], [1], [0, 0, 1, 1], [], []>} : vector<64x288xf32>, vector<288x8xf32>, vector<64x8xf32> -> vector<64x8xf32>
    %c0_3 = arith.constant 0 : index
    %c0_4 = arith.constant 0 : index
    %3 = vector.load %arg3[%c0_3, %c0_4] : memref<64x1xf32, #tpu.memory_space<vmem>>, vector<64x1xf32>
    %4 = vector.broadcast %3 : vector<64x1xf32> to vector<64x8xf32>
    %5 = arith.addf %2, %4 : vector<64x8xf32>
    %cst_5 = arith.constant 0.000000e+00 : f32
    %6 = vector.broadcast %cst_5 : f32 to vector<64x8xf32>
    %7 = arith.maximumf %5, %6 : vector<64x8xf32>
    %c0_6 = arith.constant 0 : index
    %c0_7 = arith.constant 0 : index
    %8 = vector.load %arg4[%c0_6, %c0_7] : memref<64x8xf32, #tpu.memory_space<vmem>>, vector<64x8xf32>
    tpu.vector_store %arg4[%c0_6, %c0_7], %7 {strides = array<i32>} : memref<64x8xf32, #tpu.memory_space<vmem>>, vector<64x8xf32>,
    return
  }
  func.func @transform_0(%arg0: i32) -> (i32, i32) {
    %c0_i32 = arith.constant 0 : i32
    %c0_i32_0 = arith.constant 0 : i32
    return %c0_i32, %arg0 : i32, i32
  }
  func.func @transform_1(%arg0: i32) -> (i32, i32) {
    %c0_i32 = arith.constant 0 : i32
    %c0_i32_0 = arith.constant 0 : i32
    %c0_i32_1 = arith.constant 0 : i32
    return %c0_i32, %c0_i32_0 : i32, i32
  }
  func.func @transform_2(%arg0: i32) -> (i32, i32) {
    %c0_i32 = arith.constant 0 : i32
    %c0_i32_0 = arith.constant 0 : i32
    %c0_i32_1 = arith.constant 0 : i32
    return %c0_i32, %c0_i32_0 : i32, i32
  }
  func.func @transform_3(%arg0: i32) -> (i32, i32) {
    %c0_i32 = arith.constant 0 : i32
    %c0_i32_0 = arith.constant 0 : i32
    return %c0_i32, %arg0 : i32, i32
  }
}

module attributes {stable_mosaic.version = 11 : i64} {
  func.func @_conv_res_kernel(%arg0: i32, %arg1: memref<576x8xf32, #tpu.memory_space<vmem>>, %arg2: memref<64x576xf32, #tpu.memory_space<vmem>>, %arg3: memref<64x1xf32, #tpu.memory_space<vmem>>, %arg4: memref<64x8xf32, #tpu.memory_space<vmem>>, %arg5: memref<64x8xf32, #tpu.memory_space<vmem>>) attributes {dimension_semantics = [#tpu.dimension_semantics<parallel>], iteration_bounds = array<i64: 1>, scalar_prefetch = 0 : i64, scratch_operands = 0 : i64, tpu.core_type = #tpu.core_type<tc>, window_params = [{transform_indices = @transform_0, window_bounds = array<i64: 576, 8>}, {pipeline_mode = #tpu.pipeline_mode<synchronous>, transform_indices = @transform_1, window_bounds = array<i64: 64, 576>}, {pipeline_mode = #tpu.pipeline_mode<synchronous>, transform_indices = @transform_2, window_bounds = array<i64: 64, 1>}, {transform_indices = @transform_3, window_bounds = array<i64: 64, 8>}, {transform_indices = @transform_4, window_bounds = array<i64: 64, 8>}]} {
    %c0 = arith.constant 0 : index
    %c0_0 = arith.constant 0 : index
    %0 = vector.load %arg2[%c0, %c0_0] : memref<64x576xf32, #tpu.memory_space<vmem>>, vector<64x576xf32>
    %c0_1 = arith.constant 0 : index
    %c0_2 = arith.constant 0 : index
    %1 = vector.load %arg1[%c0_1, %c0_2] : memref<576x8xf32, #tpu.memory_space<vmem>>, vector<576x8xf32>
    %cst = arith.constant dense<0.000000e+00> : vector<64x8xf32>
    %2 = tpu.matmul %0, %1, %cst {dimension_numbers = #tpu.dot_dimension_numbers<[1], [0], [0], [1], [0, 0, 1, 1], [], []>} : vector<64x576xf32>, vector<576x8xf32>, vector<64x8xf32> -> vector<64x8xf32>
    %c0_3 = arith.constant 0 : index
    %c0_4 = arith.constant 0 : index
    %3 = vector.load %arg3[%c0_3, %c0_4] : memref<64x1xf32, #tpu.memory_space<vmem>>, vector<64x1xf32>
    %4 = vector.broadcast %3 : vector<64x1xf32> to vector<64x8xf32>
    %5 = arith.addf %2, %4 : vector<64x8xf32>
    %c0_5 = arith.constant 0 : index
    %c0_6 = arith.constant 0 : index
    %6 = vector.load %arg4[%c0_5, %c0_6] : memref<64x8xf32, #tpu.memory_space<vmem>>, vector<64x8xf32>
    %7 = arith.addf %5, %6 : vector<64x8xf32>
    %cst_7 = arith.constant 0.000000e+00 : f32
    %8 = vector.broadcast %cst_7 : f32 to vector<64x8xf32>
    %9 = arith.maximumf %7, %8 : vector<64x8xf32>
    %c0_8 = arith.constant 0 : index
    %c0_9 = arith.constant 0 : index
    %10 = vector.load %arg5[%c0_8, %c0_9] : memref<64x8xf32, #tpu.memory_space<vmem>>, vector<64x8xf32>
    tpu.vector_store %arg5[%c0_8, %c0_9], %9 {strides = array<i32>} : memref<64x8xf32, #tpu.memory_space<vmem>>, vector<64x8xf32>,
    return
  }
  func.func @transform_0(%arg0: i32) -> (i32, i32) {
    %c0_i32 = arith.constant 0 : i32
    %c0_i32_0 = arith.constant 0 : i32
    return %c0_i32, %arg0 : i32, i32
  }
  func.func @transform_1(%arg0: i32) -> (i32, i32) {
    %c0_i32 = arith.constant 0 : i32
    %c0_i32_0 = arith.constant 0 : i32
    %c0_i32_1 = arith.constant 0 : i32
    return %c0_i32, %c0_i32_0 : i32, i32
  }
  func.func @transform_2(%arg0: i32) -> (i32, i32) {
    %c0_i32 = arith.constant 0 : i32
    %c0_i32_0 = arith.constant 0 : i32
    %c0_i32_1 = arith.constant 0 : i32
    return %c0_i32, %c0_i32_0 : i32, i32
  }
  func.func @transform_3(%arg0: i32) -> (i32, i32) {
    %c0_i32 = arith.constant 0 : i32
    %c0_i32_0 = arith.constant 0 : i32
    return %c0_i32, %arg0 : i32, i32
  }
  func.func @transform_4(%arg0: i32) -> (i32, i32) {
    %c0_i32 = arith.constant 0 : i32
    %c0_i32_0 = arith.constant 0 : i32
    return %c0_i32, %arg0 : i32, i32
  }
}

module attributes {stable_mosaic.version = 11 : i64} {
  func.func @_head_kernel(%arg0: memref<64x2x4xf32, #tpu.memory_space<vmem>>, %arg1: memref<10x64xf32, #tpu.memory_space<vmem>>, %arg2: memref<10x1xf32, #tpu.memory_space<vmem>>, %arg3: memref<10x2xf32, #tpu.memory_space<vmem>>) attributes {dimension_semantics = [], scalar_prefetch = 0 : i64, scratch_operands = 0 : i64, tpu.core_type = #tpu.core_type<tc>} {
    %c0 = arith.constant 0 : index
    %c0_0 = arith.constant 0 : index
    %c0_1 = arith.constant 0 : index
    %0 = vector.load %arg0[%c0, %c0_0, %c0_1] : memref<64x2x4xf32, #tpu.memory_space<vmem>>, vector<64x2x4xf32>
    %cst = arith.constant dense<0.000000e+00> : vector<64x2xf32>
    %1 = vector.multi_reduction <add>, %0, %cst [2] : vector<64x2x4xf32> to vector<64x2xf32>
    %cst_2 = arith.constant 4.000000e+00 : f32
    %2 = vector.broadcast %cst_2 : f32 to vector<64x2xf32>
    %3 = arith.divf %1, %2 : vector<64x2xf32>
    %c0_3 = arith.constant 0 : index
    %c0_4 = arith.constant 0 : index
    %4 = vector.load %arg1[%c0_3, %c0_4] : memref<10x64xf32, #tpu.memory_space<vmem>>, vector<10x64xf32>
    %cst_5 = arith.constant dense<0.000000e+00> : vector<10x2xf32>
    %5 = tpu.matmul %4, %3, %cst_5 {dimension_numbers = #tpu.dot_dimension_numbers<[1], [0], [0], [1], [0, 0, 1, 1], [], []>} : vector<10x64xf32>, vector<64x2xf32>, vector<10x2xf32> -> vector<10x2xf32>
    %c0_6 = arith.constant 0 : index
    %c0_7 = arith.constant 0 : index
    %6 = vector.load %arg2[%c0_6, %c0_7] : memref<10x1xf32, #tpu.memory_space<vmem>>, vector<10x1xf32>
    %7 = vector.broadcast %6 : vector<10x1xf32> to vector<10x2xf32>
    %8 = arith.addf %5, %7 : vector<10x2xf32>
    %c0_8 = arith.constant 0 : index
    %c0_9 = arith.constant 0 : index
    %9 = vector.load %arg3[%c0_8, %c0_9] : memref<10x2xf32, #tpu.memory_space<vmem>>, vector<10x2xf32>
    tpu.vector_store %arg3[%c0_8, %c0_9], %8 {strides = array<i32>} : memref<10x2xf32, #tpu.memory_space<vmem>>, vector<10x2xf32>,
    return
  }
}

</mosaic_0001>

<bundles_post_ra>
// kernel: _lambda_.8
= control target key start
LH: loop header
LB: loop body
LE: loop exit
PB: predicated region body
PF: predicated region fallthrough
CT: control target
= control target key end

     0   :  { %vm39_vm0 = vcmask 1042432   ;;  %vm32_vm1 = vcmask 220160   ;;  %v148_v2 = vmov 0   ;;  %s201_s0 = inlined_call_operand.vmem [shape: f32[27,128], index: 0, kind: input, shape index: {}]   ;;  %s202_s1 = inlined_call_operand.vmem [shape: f32[16,27], index: 1, kind: input, shape index: {}]   ;;  %s203_s2 = inlined_call_operand.vmem [shape: f32[16,1], index: 2, kind: input, shape index: {}]   ;;  %s204_s3 = inlined_call_operand.vmem [shape: f32[16,128], index: 3, kind: output, shape index: {}]  }
   0x1   :  { %v19_v0 = vld [vmem:[%s201_s0 + $0x18] sm:$0x7]  ;;  %v18_v1 = vld [vmem:[%s201_s0 + $0x10] sm:$0xff]  ;;  %147 = vset.pattern.permute.xlu0 %v148_v2  ;;  %v14_v3 = vld [vmem:[%s202_s1] sm:$0xff] }
   0x2   :  { %135 = vmatprep.subr.msk.mxu0 %vm39_vm0, %v19_v0  ;;  %v17_v4 = vld [vmem:[%s201_s0 + $0x8] sm:$0xff]  ;;  %143 = vmatprep.mubr.msk.f32.mxu0 %vm32_vm1, %v14_v3  ;;  %v20_v5 = vld [vmem:[%s203_s2] sm:$0xff] }
   0x3   :  { %136 = vmatpush3.msk.msra.mxu0 %vm39_vm0, %v19_v0  ;;  %24 = vperm.xlu0 %147, %v20_v5   ;;  %v16_v6 = vld [vmem:[%s201_s0] sm:$0xff]  ;;  %v21_v7 = vld [vmem:[%s203_s2 + $0x8] sm:$0xff] }
   0x4   :  { %137 = vmatprep.subr.mxu0 %v18_v1  ;;  %v15_v8 = vld [vmem:[%s202_s1 + $0x8] sm:$0xff] }
   0x5   :  { %138 = vmatpush3.msra.mxu0 %v18_v1 }
   0x6   :  { %139 = vmatprep.subr.mxu0 %v17_v4 }
   0x7   :  { %140 = vmatpush3.msra.mxu0 %v17_v4  ;;  %29 = vperm.xlu0 %147, %v21_v7  }
   0x8   :  { %141 = vmatprep.subr.mxu0 %v16_v6 }
   0x9   :  { %142 = vmatpush3.msra.mxu0 %v16_v6 }
   0xa   :  { %144 = vmatmul.mubr.msk.f32.vlgmr.msra.gmra.mxu0 %vm32_vm1, %v15_v8 }
  0x7e   :  { %v25_v9 = vpop.permute.xlu0 %24 }
  0x82   :  { %v30_v10 = vpop.permute.xlu0 %29 }
  0xca   :  { %v145_v11 = vpop.f32.mrf.mxu0 }
  0xcb   :  { %v115_v12 = vadd.f32 %v145_v11, %v30_v10 }
  0xcc   :  { %v109_v13 = vpop.f32.mrf.mxu0 }
  0xcd   :  { %v119_v14 = vmax.f32 %v115_v12, 0.0  ;;  %v110_v15 = vadd.f32 %v109_v13, %v25_v9 }
  0xcf   :  { %121 = vst [vmem:[%s204_s3 + $0x8] sm:$0xff] %v119_v14  ;;  %v118_v16 = vmax.f32 %v110_v15, 0.0 }
  0xd1   :  { %120 = vst [vmem:[%s204_s3] sm:$0xff] %v118_v16 }

// kernel: _lambda_.9
= control target key start
LH: loop header
LB: loop body
LE: loop exit
PB: predicated region body
PF: predicated region fallthrough
CT: control target
= control target key end

     0   :  { %v179_v0 = vmov 0.0   ;;  %vm48_vm0 = vcmask 130048   ;;  %v180_v24 = vmov 0   ;;  %s315_s0 = inlined_call_operand.vmem [shape: f32[144,128], index: 0, kind: input, shape index: {}]   ;;  %s316_s1 = inlined_call_operand.vmem [shape: f32[16,144], index: 1, kind: input, shape index: {}]   ;;  %s317_s2 = inlined_call_operand.vmem [shape: f32[16,1], index: 2, kind: input, shape index: {}]   ;;  %s318_s3 = inlined_call_operand.vmem [shape: f32[16,128], index: 3, kind: output, shape index: {}]  }
   0x1   :  { %55 = vmatprep.subr.mxu0 %v179_v0  ;;  %140 = vmatprep.subr.mxu1 %v179_v0  ;;  %v33_v1 = vld [vmem:[%s315_s0 + $0x78] sm:$0xff]  ;;  %v32_v2 = vld [vmem:[%s315_s0 + $0x70] sm:$0xff]  ;;  %v31_v3 = vld [vmem:[%s315_s0 + $0x68] sm:$0xff] }
   0x2   :  { %56 = vmatpush1.msra.mxu0 %v33_v1  ;;  %158 = vmatpush1.msra.mxu1 %v33_v1  ;;  %v30_v4 = vld [vmem:[%s315_s0 + $0x60] sm:$0xff]  ;;  %v29_v5 = vld [vmem:[%s315_s0 + $0x58] sm:$0xff]  ;;  %v28_v6 = vld [vmem:[%s315_s0 + $0x50] sm:$0xff] }
   0x3   :  { %57 = vmatprep.subr.mxu0 %v179_v0  ;;  %141 = vmatprep.subr.mxu1 %v179_v0  ;;  %v27_v7 = vld [vmem:[%s315_s0 + $0x48] sm:$0xff]  ;;  %v26_v8 = vld [vmem:[%s315_s0 + $0x40] sm:$0xff]  ;;  %v25_v9 = vld [vmem:[%s315_s0 + $0x38] sm:$0xff] }
   0x4   :  { %58 = vmatpush1.msra.mxu0 %v32_v2  ;;  %159 = vmatpush1.msra.mxu1 %v32_v2  ;;  %v24_v10 = vld [vmem:[%s315_s0 + $0x30] sm:$0xff]  ;;  %v23_v11 = vld [vmem:[%s315_s0 + $0x28] sm:$0xff]  ;;  %v22_v12 = vld [vmem:[%s315_s0 + $0x20] sm:$0xff] }
   0x5   :  { %59 = vmatprep.subr.mxu0 %v179_v0  ;;  %142 = vmatprep.subr.mxu1 %v179_v0  ;;  %v21_v13 = vld [vmem:[%s315_s0 + $0x18] sm:$0xff]  ;;  %v20_v14 = vld [vmem:[%s315_s0 + $0x10] sm:$0xff]  ;;  %v19_v15 = vld [vmem:[%s315_s0 + $0x8] sm:$0xff] }
   0x6   :  { %60 = vmatpush1.msra.mxu0 %v31_v3  ;;  %160 = vmatpush1.msra.mxu1 %v31_v3  ;;  %v18_v16 = vld [vmem:[%s315_s0] sm:$0xff]  ;;  %v35_v17 = vld [vmem:[%s315_s0 + $0x88] sm:$0xff]  ;;  %v17_v20 = vld [vmem:[%s316_s1 + $0x18] sm:$0xff] }
   0x7   :  { %61 = vmatprep.subr.mxu0 %v179_v0  ;;  %143 = vmatprep.subr.mxu1 %v179_v0  ;;  %v34_v18 = vld [vmem:[%s315_s0 + $0x80] sm:$0xff]  ;;  %v15_v19 = vld [vmem:[%s316_s1 + $0x8] sm:$0xff]  ;;  %v16_v22 = vld [vmem:[%s316_s1 + $0x10] sm:$0xff] }
   0x8   :  { %62 = vmatpush1.msra.mxu0 %v30_v4  ;;  %161 = vmatpush1.msra.mxu1 %v30_v4  ;;  %v14_v21 = vld [vmem:[%s316_s1] sm:$0xff]  ;;  %v37_v25 = vld [vmem:[%s317_s2 + $0x8] sm:$0xff] }
   0x9   :  { %63 = vmatprep.subr.mxu0 %v179_v0  ;;  %144 = vmatprep.subr.mxu1 %v179_v0  ;;  %v36_v23 = vld [vmem:[%s317_s2] sm:$0xff] }
   0xa   :  { %64 = vmatpush1.msra.mxu0 %v29_v5  ;;  %162 = vmatpush1.msra.mxu1 %v29_v5 }
   0xb   :  { %65 = vmatprep.subr.mxu0 %v179_v0  ;;  %145 = vmatprep.subr.mxu1 %v179_v0 }
   0xc   :  { %66 = vmatpush1.msra.mxu0 %v28_v6  ;;  %163 = vmatpush1.msra.mxu1 %v28_v6 }
   0xd   :  { %67 = vmatprep.subr.mxu0 %v179_v0  ;;  %146 = vmatprep.subr.mxu1 %v179_v0 }
   0xe   :  { %68 = vmatpush1.msra.mxu0 %v27_v7  ;;  %164 = vmatpush1.msra.mxu1 %v27_v7 }
   0xf   :  { %69 = vmatprep.subr.mxu0 %v179_v0  ;;  %147 = vmatprep.subr.mxu1 %v179_v0 }
  0x10   :  { %70 = vmatpush1.msra.mxu0 %v26_v8  ;;  %165 = vmatpush1.msra.mxu1 %v26_v8 }
  0x11   :  { %71 = vmatprep.subr.mxu0 %v179_v0  ;;  %148 = vmatprep.subr.mxu1 %v179_v0 }
  0x12   :  { %72 = vmatpush1.msra.mxu0 %v25_v9  ;;  %166 = vmatpush1.msra.mxu1 %v25_v9 }
  0x13   :  { %73 = vmatprep.subr.mxu0 %v179_v0  ;;  %149 = vmatprep.subr.mxu1 %v179_v0 }
  0x14   :  { %74 = vmatpush1.msra.mxu0 %v24_v10  ;;  %167 = vmatpush1.msra.mxu1 %v24_v10 }
  0x15   :  { %75 = vmatprep.subr.mxu0 %v179_v0  ;;  %150 = vmatprep.subr.mxu1 %v179_v0 }
  0x16   :  { %76 = vmatpush1.msra.mxu0 %v23_v11  ;;  %168 = vmatpush1.msra.mxu1 %v23_v11 }
  0x17   :  { %77 = vmatprep.subr.mxu0 %v179_v0  ;;  %151 = vmatprep.subr.mxu1 %v179_v0 }
  0x18   :  { %78 = vmatpush1.msra.mxu0 %v22_v12  ;;  %169 = vmatpush1.msra.mxu1 %v22_v12 }
  0x19   :  { %79 = vmatprep.subr.mxu0 %v179_v0  ;;  %152 = vmatprep.subr.mxu1 %v179_v0 }
  0x1a   :  { %80 = vmatpush1.msra.mxu0 %v21_v13  ;;  %170 = vmatpush1.msra.mxu1 %v21_v13 }
  0x1b   :  { %81 = vmatprep.subr.mxu0 %v179_v0  ;;  %153 = vmatprep.subr.mxu1 %v179_v0 }
  0x1c   :  { %82 = vmatpush1.msra.mxu0 %v20_v14  ;;  %171 = vmatpush1.msra.mxu1 %v20_v14 }
  0x1d   :  { %83 = vmatprep.subr.mxu0 %v179_v0  ;;  %154 = vmatprep.subr.mxu1 %v179_v0 }
  0x1e   :  { %84 = vmatpush1.msra.mxu0 %v19_v15  ;;  %172 = vmatpush1.msra.mxu1 %v19_v15 }
  0x1f   :  { %85 = vmatprep.subr.mxu0 %v179_v0  ;;  %155 = vmatprep.subr.mxu1 %v179_v0 }
  0x20   :  { %86 = vmatpush1.msra.mxu0 %v18_v16  ;;  %173 = vmatpush1.msra.mxu1 %v18_v16 }
  0x21   :  { %115 = vmatprep.subr.mxu0 %v179_v0  ;;  %156 = vmatprep.subr.mxu1 %v179_v0 }
  0x22   :  { %116 = vmatpush2.msra.mxu0 %v35_v17  ;;  %174 = vmatpush2.msra.mxu1 %v35_v17 }
  0x23   :  { %117 = vmatprep.subr.mxu0 %v179_v0  ;;  %157 = vmatprep.subr.mxu1 %v179_v0 }
  0x24   :  { %118 = vmatpush2.msra.mxu0 %v34_v18  ;;  %175 = vmatpush2.msra.mxu1 %v34_v18 }
  0x25   :  { %138 = vmatprep.mubr.msk.f32.mxu0 %vm48_vm0, %v15_v19  ;;  %139 = vmatprep.mubr.msk.f32.mxu1 %vm48_vm0, %v17_v20 }
  0x26   :  { %120 = vmatmul.mubr.f32.vlgmr.msra.gmra.mxu0 %v14_v21  ;;  %125 = vmatmul.mubr.f32.vlgmr.msra.gmra.mxu1 %v16_v22 }
  0x27   :  { %178 = vset.pattern.permute.xlu0 %v180_v24 }
  0x28   :  { %40 = vperm.xlu0 %178, %v36_v23  }
  0x2c   :  { %45 = vperm.xlu0 %178, %v37_v25  }
  0xa3   :  { %v41_v26 = vpop.permute.xlu0 %40 }
  0xa7   :  { %v46_v27 = vpop.permute.xlu0 %45 }
  0xe6   :  { %v121_v28 = vpop.f32.mrf.mxu0  ;;  %v126_v29 = vpop.f32.mrf.mxu1 }
  0xe7   :  { %v122_v30 = vadd.f32 %v121_v28, %v41_v26  ;;  %v127_v31 = vadd.f32 %v126_v29, %v46_v27 }
  0xe8   :  { %v123_v32 = vpop.f32.mrf.mxu0  ;;  %v128_v33 = vpop.f32.mrf.mxu1 }
  0xe9   :  { %v130_v34 = vmax.f32 %v122_v30, 0.0  ;;  %v131_v35 = vmax.f32 %v127_v31, 0.0 }
  0xeb   :  { %132 = vst [vmem:[%s318_s3] sm:$0xff] %v130_v34  ;;  %133 = vst [vmem:[%s318_s3 + $0x8] sm:$0xff] %v131_v35 }

// kernel: _lambda_.10
= control target key start
LH: loop header
LB: loop body
LE: loop exit
PB: predicated region body
PF: predicated region fallthrough
CT: control target
= control target key end

     0   :  { %v186_v0 = vmov 0.0   ;;  %vm51_vm0 = vcmask 130048   ;;  %v187_v24 = vmov 0   ;;  %s333_s0 = inlined_call_operand.vmem [shape: f32[144,128], index: 0, kind: input, shape index: {}]   ;;  %s334_s1 = inlined_call_operand.vmem [shape: f32[16,144], index: 1, kind: input, shape index: {}]   ;;  %s335_s2 = inlined_call_operand.vmem [shape: f32[16,1], index: 2, kind: input, shape index: {}]   ;;  %s336_s3 = inlined_call_operand.vmem [shape: f32[16,128], index: 3, kind: input, shape index: {}]   ;;  %s337_s4 = inlined_call_operand.vmem [shape: f32[16,128], index: 4, kind: output, shape index: {}]  }
   0x1   :  { %58 = vmatprep.subr.mxu0 %v186_v0  ;;  %147 = vmatprep.subr.mxu1 %v186_v0  ;;  %v36_v1 = vld [vmem:[%s333_s0 + $0x78] sm:$0xff]  ;;  %v35_v2 = vld [vmem:[%s333_s0 + $0x70] sm:$0xff]  ;;  %v34_v3 = vld [vmem:[%s333_s0 + $0x68] sm:$0xff] }
   0x2   :  { %59 = vmatpush1.msra.mxu0 %v36_v1  ;;  %165 = vmatpush1.msra.mxu1 %v36_v1  ;;  %v33_v4 = vld [vmem:[%s333_s0 + $0x60] sm:$0xff]  ;;  %v32_v5 = vld [vmem:[%s333_s0 + $0x58] sm:$0xff]  ;;  %v31_v6 = vld [vmem:[%s333_s0 + $0x50] sm:$0xff] }
   0x3   :  { %60 = vmatprep.subr.mxu0 %v186_v0  ;;  %148 = vmatprep.subr.mxu1 %v186_v0  ;;  %v30_v7 = vld [vmem:[%s333_s0 + $0x48] sm:$0xff]  ;;  %v29_v8 = vld [vmem:[%s333_s0 + $0x40] sm:$0xff]  ;;  %v28_v9 = vld [vmem:[%s333_s0 + $0x38] sm:$0xff] }
   0x4   :  { %61 = vmatpush1.msra.mxu0 %v35_v2  ;;  %166 = vmatpush1.msra.mxu1 %v35_v2  ;;  %v27_v10 = vld [vmem:[%s333_s0 + $0x30] sm:$0xff]  ;;  %v26_v11 = vld [vmem:[%s333_s0 + $0x28] sm:$0xff]  ;;  %v25_v12 = vld [vmem:[%s333_s0 + $0x20] sm:$0xff] }
   0x5   :  { %62 = vmatprep.subr.mxu0 %v186_v0  ;;  %149 = vmatprep.subr.mxu1 %v186_v0  ;;  %v24_v13 = vld [vmem:[%s333_s0 + $0x18] sm:$0xff]  ;;  %v23_v14 = vld [vmem:[%s333_s0 + $0x10] sm:$0xff]  ;;  %v22_v15 = vld [vmem:[%s333_s0 + $0x8] sm:$0xff] }
   0x6   :  { %63 = vmatpush1.msra.mxu0 %v34_v3  ;;  %167 = vmatpush1.msra.mxu1 %v34_v3  ;;  %v21_v16 = vld [vmem:[%s333_s0] sm:$0xff]  ;;  %v38_v17 = vld [vmem:[%s333_s0 + $0x88] sm:$0xff]  ;;  %v20_v20 = vld [vmem:[%s334_s1 + $0x18] sm:$0xff] }
   0x7   :  { %64 = vmatprep.subr.mxu0 %v186_v0  ;;  %150 = vmatprep.subr.mxu1 %v186_v0  ;;  %v37_v18 = vld [vmem:[%s333_s0 + $0x80] sm:$0xff]  ;;  %v18_v19 = vld [vmem:[%s334_s1 + $0x8] sm:$0xff]  ;;  %v19_v22 = vld [vmem:[%s334_s1 + $0x10] sm:$0xff] }
   0x8   :  { %65 = vmatpush1.msra.mxu0 %v33_v4  ;;  %168 = vmatpush1.msra.mxu1 %v33_v4  ;;  %v17_v21 = vld [vmem:[%s334_s1] sm:$0xff]  ;;  %v40_v25 = vld [vmem:[%s335_s2 + $0x8] sm:$0xff] }
   0x9   :  { %66 = vmatprep.subr.mxu0 %v186_v0  ;;  %151 = vmatprep.subr.mxu1 %v186_v0  ;;  %v39_v23 = vld [vmem:[%s335_s2] sm:$0xff]  ;;  %v134_v31 = vld [vmem:[%s336_s3 + $0x8] sm:$0xff] }
   0xa   :  { %67 = vmatpush1.msra.mxu0 %v32_v5  ;;  %169 = vmatpush1.msra.mxu1 %v32_v5  ;;  %v133_v29 = vld [vmem:[%s336_s3] sm:$0xff] }
   0xb   :  { %68 = vmatprep.subr.mxu0 %v186_v0  ;;  %152 = vmatprep.subr.mxu1 %v186_v0 }
   0xc   :  { %69 = vmatpush1.msra.mxu0 %v31_v6  ;;  %170 = vmatpush1.msra.mxu1 %v31_v6 }
   0xd   :  { %70 = vmatprep.subr.mxu0 %v186_v0  ;;  %153 = vmatprep.subr.mxu1 %v186_v0 }
   0xe   :  { %71 = vmatpush1.msra.mxu0 %v30_v7  ;;  %171 = vmatpush1.msra.mxu1 %v30_v7 }
   0xf   :  { %72 = vmatprep.subr.mxu0 %v186_v0  ;;  %154 = vmatprep.subr.mxu1 %v186_v0 }
  0x10   :  { %73 = vmatpush1.msra.mxu0 %v29_v8  ;;  %172 = vmatpush1.msra.mxu1 %v29_v8 }
  0x11   :  { %74 = vmatprep.subr.mxu0 %v186_v0  ;;  %155 = vmatprep.subr.mxu1 %v186_v0 }
  0x12   :  { %75 = vmatpush1.msra.mxu0 %v28_v9  ;;  %173 = vmatpush1.msra.mxu1 %v28_v9 }
  0x13   :  { %76 = vmatprep.subr.mxu0 %v186_v0  ;;  %156 = vmatprep.subr.mxu1 %v186_v0 }
  0x14   :  { %77 = vmatpush1.msra.mxu0 %v27_v10  ;;  %174 = vmatpush1.msra.mxu1 %v27_v10 }
  0x15   :  { %78 = vmatprep.subr.mxu0 %v186_v0  ;;  %157 = vmatprep.subr.mxu1 %v186_v0 }
  0x16   :  { %79 = vmatpush1.msra.mxu0 %v26_v11  ;;  %175 = vmatpush1.msra.mxu1 %v26_v11 }
  0x17   :  { %80 = vmatprep.subr.mxu0 %v186_v0  ;;  %158 = vmatprep.subr.mxu1 %v186_v0 }
  0x18   :  { %81 = vmatpush1.msra.mxu0 %v25_v12  ;;  %176 = vmatpush1.msra.mxu1 %v25_v12 }
  0x19   :  { %82 = vmatprep.subr.mxu0 %v186_v0  ;;  %159 = vmatprep.subr.mxu1 %v186_v0 }
  0x1a   :  { %83 = vmatpush1.msra.mxu0 %v24_v13  ;;  %177 = vmatpush1.msra.mxu1 %v24_v13 }
  0x1b   :  { %84 = vmatprep.subr.mxu0 %v186_v0  ;;  %160 = vmatprep.subr.mxu1 %v186_v0 }
  0x1c   :  { %85 = vmatpush1.msra.mxu0 %v23_v14  ;;  %178 = vmatpush1.msra.mxu1 %v23_v14 }
  0x1d   :  { %86 = vmatprep.subr.mxu0 %v186_v0  ;;  %161 = vmatprep.subr.mxu1 %v186_v0 }
  0x1e   :  { %87 = vmatpush1.msra.mxu0 %v22_v15  ;;  %179 = vmatpush1.msra.mxu1 %v22_v15 }
  0x1f   :  { %88 = vmatprep.subr.mxu0 %v186_v0  ;;  %162 = vmatprep.subr.mxu1 %v186_v0 }
  0x20   :  { %89 = vmatpush1.msra.mxu0 %v21_v16  ;;  %180 = vmatpush1.msra.mxu1 %v21_v16 }
  0x21   :  { %118 = vmatprep.subr.mxu0 %v186_v0  ;;  %163 = vmatprep.subr.mxu1 %v186_v0 }
  0x22   :  { %119 = vmatpush2.msra.mxu0 %v38_v17  ;;  %181 = vmatpush2.msra.mxu1 %v38_v17 }
  0x23   :  { %120 = vmatprep.subr.mxu0 %v186_v0  ;;  %164 = vmatprep.subr.mxu1 %v186_v0 }
  0x24   :  { %121 = vmatpush2.msra.mxu0 %v37_v18  ;;  %182 = vmatpush2.msra.mxu1 %v37_v18 }
  0x25   :  { %145 = vmatprep.mubr.msk.f32.mxu0 %vm51_vm0, %v18_v19  ;;  %146 = vmatprep.mubr.msk.f32.mxu1 %vm51_vm0, %v20_v20 }
  0x26   :  { %123 = vmatmul.mubr.f32.vlgmr.msra.gmra.mxu0 %v17_v21  ;;  %128 = vmatmul.mubr.f32.vlgmr.msra.gmra.mxu1 %v19_v22 }
  0x27   :  { %185 = vset.pattern.permute.xlu0 %v187_v24 }
  0x28   :  { %43 = vperm.xlu0 %185, %v39_v23  }
  0x2c   :  { %48 = vperm.xlu0 %185, %v40_v25  }
  0xa3   :  { %v44_v26 = vpop.permute.xlu0 %43 }
  0xa7   :  { %v49_v27 = vpop.permute.xlu0 %48 }
  0xe6   :  { %v124_v28 = vpop.f32.mrf.mxu0  ;;  %v129_v30 = vpop.f32.mrf.mxu1 }
  0xe7   :  { %v125_v32 = vadd.f32 %v124_v28, %v44_v26  ;;  %v130_v33 = vadd.f32 %v129_v30, %v49_v27 }
  0xe8   :  { %v126_v34 = vpop.f32.mrf.mxu0  ;;  %v131_v35 = vpop.f32.mrf.mxu1 }
  0xe9   :  { %v135_v36 = vadd.f32 %v133_v29, %v125_v32  ;;  %v136_v37 = vadd.f32 %v134_v31, %v130_v33 }
  0xeb   :  { %v137_v38 = vmax.f32 %v135_v36, 0.0  ;;  %v138_v39 = vmax.f32 %v136_v37, 0.0 }
  0xed   :  { %139 = vst [vmem:[%s337_s4] sm:$0xff] %v137_v38  ;;  %140 = vst [vmem:[%s337_s4 + $0x8] sm:$0xff] %v138_v39 }

// kernel: _lambda_.11
= control target key start
LH: loop header
LB: loop body
LE: loop exit
PB: predicated region body
PF: predicated region fallthrough
CT: control target
= control target key end

     0   :  { %v219_v0 = vmov 0.0   ;;  %vm64_vm0 = vcmask 130048   ;;  %v220_v29 = vmov 0   ;;  %vm166_vm1 = vcmask 261120   ;;  %s387_s0 = inlined_call_operand.vmem [shape: f32[144,32], index: 0, kind: input, shape index: {}]   ;;  %s388_s1 = inlined_call_operand.vmem [shape: f32[32,144], index: 1, kind: input, shape index: {}]   ;;  %s389_s2 = inlined_call_operand.vmem [shape: f32[32,1], index: 2, kind: input, shape index: {}]   ;;  %s390_s3 = inlined_call_operand.vmem [shape: f32[32,32], index: 3, kind: output, shape index: {}]  }
   0x1   :  { %77 = vmatprep.subr.mxu0 %v219_v0  ;;  %179 = vmatprep.subr.mxu1 %v219_v0  ;;  %v37_v1 = vld [vmem:[%s387_s0 + $0x78] sm:$0xff]  ;;  %v36_v2 = vld [vmem:[%s387_s0 + $0x70] sm:$0xff]  ;;  %v35_v3 = vld [vmem:[%s387_s0 + $0x68] sm:$0xff] }
   0x2   :  { %78 = vmatpush1.msra.mxu0 %v37_v1  ;;  %197 = vmatpush1.msra.mxu1 %v37_v1  ;;  %v34_v4 = vld [vmem:[%s387_s0 + $0x60] sm:$0xff]  ;;  %v33_v5 = vld [vmem:[%s387_s0 + $0x58] sm:$0xff]  ;;  %v32_v6 = vld [vmem:[%s387_s0 + $0x50] sm:$0xff] }
   0x3   :  { %79 = vmatprep.subr.mxu0 %v219_v0  ;;  %180 = vmatprep.subr.mxu1 %v219_v0  ;;  %v31_v7 = vld [vmem:[%s387_s0 + $0x48] sm:$0xff]  ;;  %v30_v8 = vld [vmem:[%s387_s0 + $0x40] sm:$0xff]  ;;  %v29_v9 = vld [vmem:[%s387_s0 + $0x38] sm:$0xff] }
   0x4   :  { %80 = vmatpush1.msra.mxu0 %v36_v2  ;;  %198 = vmatpush1.msra.mxu1 %v36_v2  ;;  %v28_v10 = vld [vmem:[%s387_s0 + $0x30] sm:$0xff]  ;;  %v27_v11 = vld [vmem:[%s387_s0 + $0x28] sm:$0xff]  ;;  %v26_v12 = vld [vmem:[%s387_s0 + $0x20] sm:$0xff] }
   0x5   :  { %81 = vmatprep.subr.mxu0 %v219_v0  ;;  %181 = vmatprep.subr.mxu1 %v219_v0  ;;  %v25_v13 = vld [vmem:[%s387_s0 + $0x18] sm:$0xff]  ;;  %v24_v14 = vld [vmem:[%s387_s0 + $0x10] sm:$0xff]  ;;  %v23_v15 = vld [vmem:[%s387_s0 + $0x8] sm:$0xff] }
   0x6   :  { %82 = vmatpush1.msra.mxu0 %v35_v3  ;;  %199 = vmatpush1.msra.mxu1 %v35_v3  ;;  %v22_v16 = vld [vmem:[%s387_s0] sm:$0xff]  ;;  %v39_v17 = vld [vmem:[%s387_s0 + $0x88] sm:$0xff]  ;;  %v17_v23 = vld [vmem:[%s388_s1 + $0x18] sm:$0xff] }
   0x7   :  { %83 = vmatprep.subr.mxu0 %v219_v0  ;;  %182 = vmatprep.subr.mxu1 %v219_v0  ;;  %v38_v18 = vld [vmem:[%s387_s0 + $0x80] sm:$0xff]  ;;  %v15_v19 = vld [vmem:[%s388_s1 + $0x8] sm:$0xff]  ;;  %v21_v24 = vld [vmem:[%s388_s1 + $0x38] sm:$0xff] }
   0x8   :  { %84 = vmatpush1.msra.mxu0 %v34_v4  ;;  %200 = vmatpush1.msra.mxu1 %v34_v4  ;;  %v19_v20 = vld [vmem:[%s388_s1 + $0x28] sm:$0xff]  ;;  %v14_v21 = vld [vmem:[%s388_s1] sm:$0xff]  ;;  %v42_v25 = vld [vmem:[%s389_s2 + $0x10] sm:$0xff] }
   0x9   :  { %85 = vmatprep.subr.mxu0 %v219_v0  ;;  %183 = vmatprep.subr.mxu1 %v219_v0  ;;  %v18_v22 = vld [vmem:[%s388_s1 + $0x20] sm:$0xff]  ;;  %v16_v27 = vld [vmem:[%s388_s1 + $0x10] sm:$0xff]  ;;  %v43_v30 = vld [vmem:[%s389_s2 + $0x18] sm:$0xff] }
   0xa   :  { %86 = vmatpush1.msra.mxu0 %v33_v5  ;;  %201 = vmatpush1.msra.mxu1 %v33_v5  ;;  %v40_v26 = vld [vmem:[%s389_s2] sm:$0xff]  ;;  %v20_v28 = vld [vmem:[%s388_s1 + $0x30] sm:$0xff]  ;;  %v41_v31 = vld [vmem:[%s389_s2 + $0x8] sm:$0xff] }
   0xb   :  { %87 = vmatprep.subr.mxu0 %v219_v0  ;;  %184 = vmatprep.subr.mxu1 %v219_v0 }
   0xc   :  { %88 = vmatpush1.msra.mxu0 %v32_v6  ;;  %202 = vmatpush1.msra.mxu1 %v32_v6 }
   0xd   :  { %89 = vmatprep.subr.mxu0 %v219_v0  ;;  %185 = vmatprep.subr.mxu1 %v219_v0 }
   0xe   :  { %90 = vmatpush1.msra.mxu0 %v31_v7  ;;  %203 = vmatpush1.msra.mxu1 %v31_v7 }
   0xf   :  { %91 = vmatprep.subr.mxu0 %v219_v0  ;;  %186 = vmatprep.subr.mxu1 %v219_v0 }
  0x10   :  { %92 = vmatpush1.msra.mxu0 %v30_v8  ;;  %204 = vmatpush1.msra.mxu1 %v30_v8 }
  0x11   :  { %93 = vmatprep.subr.mxu0 %v219_v0  ;;  %187 = vmatprep.subr.mxu1 %v219_v0 }
  0x12   :  { %94 = vmatpush1.msra.mxu0 %v29_v9  ;;  %205 = vmatpush1.msra.mxu1 %v29_v9 }
  0x13   :  { %95 = vmatprep.subr.mxu0 %v219_v0  ;;  %188 = vmatprep.subr.mxu1 %v219_v0 }
  0x14   :  { %96 = vmatpush1.msra.mxu0 %v28_v10  ;;  %206 = vmatpush1.msra.mxu1 %v28_v10 }
  0x15   :  { %97 = vmatprep.subr.mxu0 %v219_v0  ;;  %189 = vmatprep.subr.mxu1 %v219_v0 }
  0x16   :  { %98 = vmatpush1.msra.mxu0 %v27_v11  ;;  %207 = vmatpush1.msra.mxu1 %v27_v11 }
  0x17   :  { %99 = vmatprep.subr.mxu0 %v219_v0  ;;  %190 = vmatprep.subr.mxu1 %v219_v0 }
  0x18   :  { %100 = vmatpush1.msra.mxu0 %v26_v12  ;;  %208 = vmatpush1.msra.mxu1 %v26_v12 }
  0x19   :  { %101 = vmatprep.subr.mxu0 %v219_v0  ;;  %191 = vmatprep.subr.mxu1 %v219_v0 }
  0x1a   :  { %102 = vmatpush1.msra.mxu0 %v25_v13  ;;  %209 = vmatpush1.msra.mxu1 %v25_v13 }
  0x1b   :  { %103 = vmatprep.subr.mxu0 %v219_v0  ;;  %192 = vmatprep.subr.mxu1 %v219_v0 }
  0x1c   :  { %104 = vmatpush1.msra.mxu0 %v24_v14  ;;  %210 = vmatpush1.msra.mxu1 %v24_v14 }
  0x1d   :  { %105 = vmatprep.subr.mxu0 %v219_v0  ;;  %193 = vmatprep.subr.mxu1 %v219_v0 }
  0x1e   :  { %106 = vmatpush1.msra.mxu0 %v23_v15  ;;  %211 = vmatpush1.msra.mxu1 %v23_v15 }
  0x1f   :  { %107 = vmatprep.subr.mxu0 %v219_v0  ;;  %194 = vmatprep.subr.mxu1 %v219_v0 }
  0x20   :  { %108 = vmatpush1.msra.mxu0 %v22_v16  ;;  %212 = vmatpush1.msra.mxu1 %v22_v16 }
  0x21   :  { %137 = vmatprep.subr.mxu0 %v219_v0  ;;  %195 = vmatprep.subr.mxu1 %v219_v0 }
  0x22   :  { %138 = vmatpush2.msra.mxu0 %v39_v17  ;;  %213 = vmatpush2.msra.mxu1 %v39_v17 }
  0x23   :  { %139 = vmatprep.subr.mxu0 %v219_v0  ;;  %196 = vmatprep.subr.mxu1 %v219_v0 }
  0x24   :  { %140 = vmatpush2.msra.mxu0 %v38_v18  ;;  %214 = vmatpush2.msra.mxu1 %v38_v18 }
  0x25   :  { %175 = vmatprep.mubr.msk.f32.mxu0 %vm64_vm0, %v15_v19  ;;  %177 = vmatprep.mubr.msk.f32.mxu1 %vm64_vm0, %v19_v20 }
  0x26   :  { %142 = vmatmul.mubr.f32.vlgmr.msra.gmra.mxu0 %v14_v21  ;;  %152 = vmatmul.mubr.f32.vlgmr.msra.gmra.mxu1 %v18_v22 }
  0x27   :  { %176 = vmatprep.mubr.msk.f32.mxu0 %vm64_vm0, %v17_v23  ;;  %178 = vmatprep.mubr.msk.f32.mxu1 %vm64_vm0, %v21_v24 }
  0x28   :  { %218 = vset.pattern.permute.xlu1 %v220_v29  ;;  %217 = vset.pattern.permute.xlu0 %v220_v29 }
  0x29   :  { %56 = vperm.xlu1 %218, %v42_v25   ;;  %46 = vperm.xlu0 %217, %v40_v26  }
  0x2a   :  { %147 = vmatmul.mubr.f32.gmra.mxu0 %v16_v27  ;;  %157 = vmatmul.mubr.f32.gmra.mxu1 %v20_v28 }
  0x2d   :  { %61 = vperm.xlu1 %218, %v43_v30   ;;  %51 = vperm.xlu0 %217, %v41_v31  }
  0xa4   :  { %v57_v32 = vpop.permute.xlu1 %56  ;;  %v47_v33 = vpop.permute.xlu0 %46 }
  0xa8   :  { %v62_v40 = vpop.permute.xlu1 %61  ;;  %v52_v41 = vpop.permute.xlu0 %51 }
  0xe6   :  { %v143_v34 = vpop.f32.mrf.mxu0  ;;  %v153_v35 = vpop.f32.mrf.mxu1 }
  0xe7   :  { %v144_v36 = vadd.f32 %v143_v34, %v47_v33  ;;  %v154_v37 = vadd.f32 %v153_v35, %v57_v32 }
  0xe8   :  { %v145_v38 = vpop.f32.mrf.mxu0  ;;  %v155_v39 = vpop.f32.mrf.mxu1 }
  0xe9   :  { %v162_v42 = vmax.f32 %v144_v36, 0.0  ;;  %v164_v43 = vmax.f32 %v154_v37, 0.0 }
  0xea   :  { %v148_v44 = vpop.f32.mrf.mxu0  ;;  %v158_v45 = vpop.f32.mrf.mxu1 }
  0xeb   :  { %167 = vst.msk [vmem:[%s390_s3] sm:$0xff] %vm166_vm1, %v162_v42  ;;  %169 = vst.msk [vmem:[%s390_s3 + $0x10] sm:$0xff] %vm166_vm1, %v164_v43  ;;  %v149_v46 = vadd.f32 %v148_v44, %v52_v41  ;;  %v159_v47 = vadd.f32 %v158_v45, %v62_v40 }
  0xec   :  { %v150_v48 = vpop.f32.mrf.mxu0  ;;  %v160_v49 = vpop.f32.mrf.mxu1 }
  0xed   :  { %v163_v50 = vmax.f32 %v149_v46, 0.0  ;;  %v165_v51 = vmax.f32 %v159_v47, 0.0 }
  0xef   :  { %168 = vst.msk [vmem:[%s390_s3 + $0x8] sm:$0xff] %vm166_vm1, %v163_v50  ;;  %170 = vst.msk [vmem:[%s390_s3 + $0x18] sm:$0xff] %vm166_vm1, %v165_v51 }

// kernel: _lambda_.12
= control target key start
LH: loop header
LB: loop body
LE: loop exit
PB: predicated region body
PF: predicated region fallthrough
CT: control target
= control target key end

     0   :  { %v365_v3 = vmov 0   ;;  %vm89_vm0 = vcmask 261120   ;;  %s579_s0 = inlined_call_operand.vmem [shape: f32[288,32], index: 0, kind: input, shape index: {}]   ;;  %s580_s1 = inlined_call_operand.vmem [shape: f32[32,288], index: 1, kind: input, shape index: {}]   ;;  %s581_s2 = inlined_call_operand.vmem [shape: f32[32,1], index: 2, kind: input, shape index: {}]   ;;  %s582_s3 = inlined_call_operand.vmem [shape: f32[32,32], index: 3, kind: input, shape index: {}]   ;;  %s583_s4 = inlined_call_operand.vmem [shape: f32[32,32], index: 4, kind: output, shape index: {}]  }
   0x1   :  { %v60_v0 = vld [vmem:[%s579_s0 + $0xf8] sm:$0xff]  ;;  %v59_v2 = vld [vmem:[%s579_s0 + $0xf0] sm:$0xff]  ;;  %363 = vset.pattern.permute.xlu0 %v365_v3  ;;  %364 = vset.pattern.permute.xlu1 %v365_v3  ;;  %v58_v5 = vld [vmem:[%s579_s0 + $0xe8] sm:$0xff] }
   0x2   :  { %v44_v1 = vld [vmem:[%s579_s0 + $0x78] sm:$0xff]  ;;  %296 = vmatprep.subr.mxu0 %v60_v0  ;;  %v43_v4 = vld [vmem:[%s579_s0 + $0x70] sm:$0xff]  ;;  %v42_v6 = vld [vmem:[%s579_s0 + $0x68] sm:$0xff] }
   0x3   :  { %297 = vmatpush3.msra.mxu0 %v44_v1  ;;  %v57_v7 = vld [vmem:[%s579_s0 + $0xe0] sm:$0xff]  ;;  %v56_v9 = vld [vmem:[%s579_s0 + $0xd8] sm:$0xff]  ;;  %v55_v11 = vld [vmem:[%s579_s0 + $0xd0] sm:$0xff] }
   0x4   :  { %298 = vmatprep.subr.mxu0 %v59_v2  ;;  %v41_v8 = vld [vmem:[%s579_s0 + $0x60] sm:$0xff]  ;;  %v40_v10 = vld [vmem:[%s579_s0 + $0x58] sm:$0xff]  ;;  %v39_v12 = vld [vmem:[%s579_s0 + $0x50] sm:$0xff] }
   0x5   :  { %299 = vmatpush3.msra.mxu0 %v43_v4  ;;  %v64_v13 = vld [vmem:[%s579_s0 + $0x118] sm:$0xff]  ;;  %v54_v14 = vld [vmem:[%s579_s0 + $0xc8] sm:$0xff]  ;;  %v63_v15 = vld [vmem:[%s579_s0 + $0x110] sm:$0xff] }
   0x6   :  { %300 = vmatprep.subr.mxu0 %v58_v5  ;;  %348 = vmatprep.subr.mxu1 %v64_v13  ;;  %v38_v16 = vld [vmem:[%s579_s0 + $0x48] sm:$0xff]  ;;  %v53_v18 = vld [vmem:[%s579_s0 + $0xc0] sm:$0xff]  ;;  %v52_v21 = vld [vmem:[%s579_s0 + $0xb8] sm:$0xff] }
   0x7   :  { %301 = vmatpush3.msra.mxu0 %v42_v6  ;;  %349 = vmatpush3.msra.mxu1 %v64_v13  ;;  %v18_v17 = vld [vmem:[%s580_s1 + $0x8] sm:$0xff]  ;;  %v37_v20 = vld [vmem:[%s579_s0 + $0x40] sm:$0xff]  ;;  %v36_v23 = vld [vmem:[%s579_s0 + $0x38] sm:$0xff] }
   0x8   :  { %302 = vmatprep.subr.mxu0 %v57_v7  ;;  %350 = vmatprep.subr.mxu1 %v63_v15  ;;  %v62_v19 = vld [vmem:[%s579_s0 + $0x108] sm:$0xff]  ;;  %v61_v22 = vld [vmem:[%s579_s0 + $0x100] sm:$0xff]  ;;  %v51_v24 = vld [vmem:[%s579_s0 + $0xb0] sm:$0xff] }
   0x9   :  { %303 = vmatpush3.msra.mxu0 %v41_v8  ;;  %166 = vmatprep.mubr.f32.mxu0 %v18_v17  ;;  %v19_v25 = vld [vmem:[%s580_s1 + $0x10] sm:$0xff]  ;;  %v22_v27 = vld [vmem:[%s580_s1 + $0x28] sm:$0xff]  ;;  %v25_v29 = vld [vmem:[%s580_s1 + $0x40] sm:$0xff] }
   0xa   :  { %304 = vmatprep.subr.mxu0 %v56_v9  ;;  %351 = vmatpush3.msra.mxu1 %v63_v15  ;;  %v35_v26 = vld [vmem:[%s579_s0 + $0x30] sm:$0xff]  ;;  %v50_v28 = vld [vmem:[%s579_s0 + $0xa8] sm:$0xff]  ;;  %v65_v31 = vld [vmem:[%s581_s2] sm:$0xff] }
   0xb   :  { %305 = vmatpush3.msra.mxu0 %v40_v10  ;;  %352 = vmatprep.subr.mxu1 %v62_v19  ;;  %v34_v30 = vld [vmem:[%s579_s0 + $0x28] sm:$0xff]  ;;  %v49_v32 = vld [vmem:[%s579_s0 + $0xa0] sm:$0xff]  ;;  %v67_v33 = vld [vmem:[%s581_s2 + $0x10] sm:$0xff] }
   0xc   :  { %306 = vmatprep.subr.mxu0 %v55_v11  ;;  %353 = vmatpush3.msra.mxu1 %v62_v19  ;;  %v33_v34 = vld [vmem:[%s579_s0 + $0x20] sm:$0xff]  ;;  %v28_v35 = vld [vmem:[%s580_s1 + $0x58] sm:$0xff]  ;;  %v66_v38 = vld [vmem:[%s581_s2 + $0x8] sm:$0xff] }
   0xd   :  { %307 = vmatpush3.msra.mxu0 %v39_v12  ;;  %354 = vmatprep.subr.mxu1 %v61_v22  ;;  %v48_v36 = vld [vmem:[%s579_s0 + $0x98] sm:$0xff]  ;;  %v47_v39 = vld [vmem:[%s579_s0 + $0x90] sm:$0xff]  ;;  %v46_v42 = vld [vmem:[%s579_s0 + $0x88] sm:$0xff] }
   0xe   :  { %308 = vmatprep.subr.mxu0 %v54_v14  ;;  %355 = vmatpush3.msra.mxu1 %v61_v22  ;;  %v32_v37 = vld [vmem:[%s579_s0 + $0x18] sm:$0xff]  ;;  %v31_v41 = vld [vmem:[%s579_s0 + $0x10] sm:$0xff]  ;;  %v30_v43 = vld [vmem:[%s579_s0 + $0x8] sm:$0xff] }
   0xf   :  { %309 = vmatpush3.msra.mxu0 %v38_v16  ;;  %356 = vmatprep.mubr.msk.f32.mxu1 %vm89_vm0, %v19_v25  ;;  %v68_v40 = vld [vmem:[%s581_s2 + $0x18] sm:$0xff]  ;;  %v45_v44 = vld [vmem:[%s579_s0 + $0x80] sm:$0xff]  ;;  %v23_v50 = vld [vmem:[%s580_s1 + $0x30] sm:$0xff] }
  0x10   :  { %310 = vmatprep.subr.mxu0 %v53_v18  ;;  %357 = vmatmul.mubr.msk.f32.vlgmr.msra.gmra.mxu1 %vm89_vm0, %v22_v27  ;;  %v29_v45 = vld [vmem:[%s579_s0] sm:$0xff]  ;;  %v20_v48 = vld [vmem:[%s580_s1 + $0x18] sm:$0xff]  ;;  %v27_v51 = vld [vmem:[%s580_s1 + $0x50] sm:$0xff] }
  0x11   :  { %311 = vmatpush3.msra.mxu0 %v37_v20  ;;  %359 = vmatprep.mubr.msk.f32.mxu1 %vm89_vm0, %v25_v29  ;;  %v17_v46 = vld [vmem:[%s580_s1] sm:$0xff]  ;;  %v24_v49 = vld [vmem:[%s580_s1 + $0x38] sm:$0xff]  ;;  %v26_v52 = vld [vmem:[%s580_s1 + $0x48] sm:$0xff] }
  0x12   :  { %312 = vmatprep.subr.mxu0 %v52_v21  ;;  %71 = vperm.xlu0 %363, %v65_v31   ;;  %v21_v47 = vld [vmem:[%s580_s1 + $0x20] sm:$0xff]  ;;  %v273_v7 = vld [vmem:[%s582_s3 + $0x8] sm:$0xff]  ;;  %v274_v17 = vld [vmem:[%s582_s3 + $0x10] sm:$0xff] }
  0x13   :  { %313 = vmatpush3.msra.mxu0 %v36_v23  ;;  %81 = vperm.xlu1 %364, %v67_v33   ;;  %v272_v62 = vld [vmem:[%s582_s3] sm:$0xff] }
  0x14   :  { %314 = vmatprep.subr.mxu0 %v51_v24  ;;  %360 = vmatmul.mubr.msk.f32.gmra.mxu1 %vm89_vm0, %v28_v35  ;;  %v275_v24 = vld [vmem:[%s582_s3 + $0x18] sm:$0xff] }
  0x15   :  { %315 = vmatpush3.msra.mxu0 %v35_v26 }
  0x16   :  { %316 = vmatprep.subr.mxu0 %v50_v28  ;;  %76 = vperm.xlu0 %363, %v66_v38  }
  0x17   :  { %317 = vmatpush3.msra.mxu0 %v34_v30  ;;  %86 = vperm.xlu1 %364, %v68_v40  }
  0x18   :  { %318 = vmatprep.subr.mxu0 %v49_v32 }
  0x19   :  { %319 = vmatpush3.msra.mxu0 %v33_v34 }
  0x1a   :  { %320 = vmatprep.subr.mxu0 %v48_v36 }
  0x1b   :  { %321 = vmatpush3.msra.mxu0 %v32_v37 }
  0x1c   :  { %322 = vmatprep.subr.mxu0 %v47_v39 }
  0x1d   :  { %323 = vmatpush3.msra.mxu0 %v31_v41 }
  0x1e   :  { %324 = vmatprep.subr.mxu0 %v46_v42 }
  0x1f   :  { %325 = vmatpush3.msra.mxu0 %v30_v43 }
  0x20   :  { %326 = vmatprep.subr.mxu0 %v45_v44 }
  0x21   :  { %327 = vmatpush3.msra.mxu0 %v29_v45 }
  0x22   :  { %167 = vmatmul.mubr.f32.vlgmr.msra.gmra.mxu0 %v17_v46 }
  0x23   :  { %171 = vmatprep.mubr.f32.mxu0 %v21_v47 }
  0x26   :  { %172 = vmatmul.mubr.f32.gmra.mxu0 %v20_v48 }
  0x27   :  { %176 = vmatprep.mubr.f32.mxu0 %v24_v49 }
  0x2a   :  { %177 = vmatmul.mubr.f32.gmra.mxu0 %v23_v50 }
  0x2b   :  { %181 = vmatprep.mubr.f32.mxu0 %v27_v51 }
  0x2e   :  { %182 = vmatmul.mubr.f32.gmra.mxu0 %v26_v52 }
  0x8d   :  { %v72_v53 = vpop.permute.xlu0 %71 }
  0x8e   :  { %v82_v6 = vpop.permute.xlu1 %81 }
  0x91   :  { %v77_v63 = vpop.permute.xlu0 %76 }
  0x92   :  { %v87_v21 = vpop.permute.xlu1 %86 }
  0xd0   :  { %v358_v55 = vpop.f32.mrf.mxu1 }
  0xd2   :  { %v253_v59 = vpop.f32.mrf.mxu1 }
  0xd4   :  { %v361_v3 = vpop.f32.mrf.mxu1 }
  0xd6   :  { %v263_v13 = vpop.f32.mrf.mxu1 }
  0xe2   :  { %v328_v54 = vpop.f32.mrf.mxu0 }
  0xe4   :  { %v329_v56 = vpop.f32.mrf.mxu0 }
  0xe5   :  { %v330_v57 = vadd.f32 %v329_v56, %v328_v54 }
  0xe6   :  { %v331_v58 = vpop.f32.mrf.mxu0 }
  0xe7   :  { %v169_v60 = vadd.f32 %v330_v57, %v72_v53 }
  0xe8   :  { %v332_v61 = vpop.f32.mrf.mxu0 }
  0xe9   :  { %v333_v0 = vadd.f32 %v332_v61, %v331_v58  ;;  %v254_v1 = vadd.f32 %v253_v59, %v169_v60 }
  0xea   :  { %v334_v2 = vpop.f32.mrf.mxu0 }
  0xeb   :  { %v276_v4 = vadd.f32 %v272_v62, %v254_v1  ;;  %v174_v5 = vadd.f32 %v333_v0, %v77_v63 }
  0xec   :  { %v335_v8 = vpop.f32.mrf.mxu0 }
  0xed   :  { %v280_v9 = vmax.f32 %v276_v4, 0.0  ;;  %v259_v10 = vadd.f32 %v358_v55, %v174_v5  ;;  %v336_v11 = vadd.f32 %v335_v8, %v334_v2 }
  0xee   :  { %v337_v12 = vpop.f32.mrf.mxu0 }
  0xef   :  { %284 = vst.msk [vmem:[%s583_s4] sm:$0xff] %vm89_vm0, %v280_v9  ;;  %v277_v14 = vadd.f32 %v273_v7, %v259_v10  ;;  %v179_v15 = vadd.f32 %v336_v11, %v82_v6 }
  0xf0   :  { %v338_v16 = vpop.f32.mrf.mxu0 }
  0xf1   :  { %v281_v18 = vmax.f32 %v277_v14, 0.0  ;;  %v339_v19 = vadd.f32 %v338_v16, %v337_v12  ;;  %v264_v20 = vadd.f32 %v263_v13, %v179_v15 }
  0xf3   :  { %285 = vst.msk [vmem:[%s583_s4 + $0x8] sm:$0xff] %vm89_vm0, %v281_v18  ;;  %v184_v22 = vadd.f32 %v339_v19, %v87_v21  ;;  %v278_v23 = vadd.f32 %v274_v17, %v264_v20 }
  0xf5   :  { %v269_v25 = vadd.f32 %v361_v3, %v184_v22  ;;  %v282_v26 = vmax.f32 %v278_v23, 0.0 }
  0xf7   :  { %v279_v27 = vadd.f32 %v275_v24, %v269_v25  ;;  %286 = vst.msk [vmem:[%s583_s4 + $0x10] sm:$0xff] %vm89_vm0, %v282_v26 }
  0xf9   :  { %v283_v28 = vmax.f32 %v279_v27, 0.0 }
  0xfb   :  { %287 = vst.msk [vmem:[%s583_s4 + $0x18] sm:$0xff] %vm89_vm0, %v283_v28 }

// kernel: _lambda_.13
= control target key start
LH: loop header
LB: loop body
LE: loop exit
PB: predicated region body
PF: predicated region fallthrough
CT: control target
= control target key end

     0   :  { %v509_v3 = vmov 0   ;;  %vm122_vm0 = vcmask 261120   ;;  %vm365_vm1 = vcmask 64512   ;;  %s774_s0 = inlined_call_operand.vmem [shape: f32[288,8], index: 0, kind: input, shape index: {}]   ;;  %s775_s1 = inlined_call_operand.vmem [shape: f32[64,288], index: 1, kind: input, shape index: {}]   ;;  %s776_s2 = inlined_call_operand.vmem [shape: f32[64,1], index: 2, kind: input, shape index: {}]   ;;  %s777_s3 = inlined_call_operand.vmem [shape: f32[64,8], index: 3, kind: output, shape index: {}]  }
   0x1   :  { %v69_v0 = vld [vmem:[%s774_s0 + $0xf8] sm:$0xff]  ;;  %v68_v2 = vld [vmem:[%s774_s0 + $0xf0] sm:$0xff]  ;;  %507 = vset.pattern.permute.xlu0 %v509_v3  ;;  %508 = vset.pattern.permute.xlu1 %v509_v3  ;;  %v67_v5 = vld [vmem:[%s774_s0 + $0xe8] sm:$0xff] }
   0x2   :  { %v53_v1 = vld [vmem:[%s774_s0 + $0x78] sm:$0xff]  ;;  %386 = vmatprep.subr.mxu0 %v69_v0  ;;  %474 = vmatprep.subr.mxu1 %v69_v0  ;;  %v52_v4 = vld [vmem:[%s774_s0 + $0x70] sm:$0xff]  ;;  %v51_v6 = vld [vmem:[%s774_s0 + $0x68] sm:$0xff] }
   0x3   :  { %387 = vmatpush3.msra.mxu0 %v53_v1  ;;  %490 = vmatpush3.msra.mxu1 %v53_v1  ;;  %v66_v7 = vld [vmem:[%s774_s0 + $0xe0] sm:$0xff]  ;;  %v65_v9 = vld [vmem:[%s774_s0 + $0xd8] sm:$0xff]  ;;  %v64_v11 = vld [vmem:[%s774_s0 + $0xd0] sm:$0xff] }
   0x4   :  { %388 = vmatprep.subr.mxu0 %v68_v2  ;;  %475 = vmatprep.subr.mxu1 %v68_v2  ;;  %v50_v8 = vld [vmem:[%s774_s0 + $0x60] sm:$0xff]  ;;  %v49_v10 = vld [vmem:[%s774_s0 + $0x58] sm:$0xff]  ;;  %v48_v12 = vld [vmem:[%s774_s0 + $0x50] sm:$0xff] }
   0x5   :  { %389 = vmatpush3.msra.mxu0 %v52_v4  ;;  %491 = vmatpush3.msra.mxu1 %v52_v4  ;;  %v63_v13 = vld [vmem:[%s774_s0 + $0xc8] sm:$0xff]  ;;  %v62_v15 = vld [vmem:[%s774_s0 + $0xc0] sm:$0xff]  ;;  %v61_v17 = vld [vmem:[%s774_s0 + $0xb8] sm:$0xff] }
   0x6   :  { %390 = vmatprep.subr.mxu0 %v67_v5  ;;  %476 = vmatprep.subr.mxu1 %v67_v5  ;;  %v47_v14 = vld [vmem:[%s774_s0 + $0x48] sm:$0xff]  ;;  %v46_v16 = vld [vmem:[%s774_s0 + $0x40] sm:$0xff]  ;;  %v45_v18 = vld [vmem:[%s774_s0 + $0x38] sm:$0xff] }
   0x7   :  { %391 = vmatpush3.msra.mxu0 %v51_v6  ;;  %492 = vmatpush3.msra.mxu1 %v51_v6  ;;  %v60_v19 = vld [vmem:[%s774_s0 + $0xb0] sm:$0xff]  ;;  %v59_v21 = vld [vmem:[%s774_s0 + $0xa8] sm:$0xff]  ;;  %v58_v23 = vld [vmem:[%s774_s0 + $0xa0] sm:$0xff] }
   0x8   :  { %392 = vmatprep.subr.mxu0 %v66_v7  ;;  %477 = vmatprep.subr.mxu1 %v66_v7  ;;  %v44_v20 = vld [vmem:[%s774_s0 + $0x30] sm:$0xff]  ;;  %v43_v22 = vld [vmem:[%s774_s0 + $0x28] sm:$0xff]  ;;  %v42_v24 = vld [vmem:[%s774_s0 + $0x20] sm:$0xff] }
   0x9   :  { %393 = vmatpush3.msra.mxu0 %v50_v8  ;;  %493 = vmatpush3.msra.mxu1 %v50_v8  ;;  %v57_v25 = vld [vmem:[%s774_s0 + $0x98] sm:$0xff]  ;;  %v56_v27 = vld [vmem:[%s774_s0 + $0x90] sm:$0xff]  ;;  %v55_v29 = vld [vmem:[%s774_s0 + $0x88] sm:$0xff] }
   0xa   :  { %394 = vmatprep.subr.mxu0 %v65_v9  ;;  %478 = vmatprep.subr.mxu1 %v65_v9  ;;  %v41_v26 = vld [vmem:[%s774_s0 + $0x18] sm:$0xff]  ;;  %v40_v28 = vld [vmem:[%s774_s0 + $0x10] sm:$0xff]  ;;  %v39_v30 = vld [vmem:[%s774_s0 + $0x8] sm:$0xff] }
   0xb   :  { %395 = vmatpush3.msra.mxu0 %v49_v10  ;;  %494 = vmatpush3.msra.mxu1 %v49_v10  ;;  %v54_v31 = vld [vmem:[%s774_s0 + $0x80] sm:$0xff]  ;;  %v15_v33 = vld [vmem:[%s775_s1 + $0x8] sm:$0xff]  ;;  %v33_v34 = vld [vmem:[%s775_s1 + $0x98] sm:$0xff] }
   0xc   :  { %396 = vmatprep.subr.mxu0 %v64_v11  ;;  %479 = vmatprep.subr.mxu1 %v64_v11  ;;  %v38_v32 = vld [vmem:[%s774_s0] sm:$0xff]  ;;  %v32_v36 = vld [vmem:[%s775_s1 + $0x90] sm:$0xff]  ;;  %v73_v37 = vld [vmem:[%s774_s0 + $0x118] sm:$0xff] }
   0xd   :  { %397 = vmatpush3.msra.mxu0 %v48_v12  ;;  %495 = vmatpush3.msra.mxu1 %v48_v12  ;;  %v14_v35 = vld [vmem:[%s775_s1] sm:$0xff]  ;;  %v36_v39 = vld [vmem:[%s775_s1 + $0xb0] sm:$0xff]  ;;  %v17_v42 = vld [vmem:[%s775_s1 + $0x18] sm:$0xff] }
   0xe   :  { %398 = vmatprep.subr.mxu0 %v63_v13  ;;  %480 = vmatprep.subr.mxu1 %v63_v13  ;;  %v18_v38 = vld [vmem:[%s775_s1 + $0x20] sm:$0xff]  ;;  %v72_v40 = vld [vmem:[%s774_s0 + $0x110] sm:$0xff]  ;;  %v35_v43 = vld [vmem:[%s775_s1 + $0xa8] sm:$0xff] }
   0xf   :  { %399 = vmatpush3.msra.mxu0 %v47_v14  ;;  %496 = vmatpush3.msra.mxu1 %v47_v14  ;;  %v74_v41 = vld [vmem:[%s776_s2] sm:$0xff]  ;;  %v71_v44 = vld [vmem:[%s774_s0 + $0x108] sm:$0xff]  ;;  %v21_v45 = vld [vmem:[%s775_s1 + $0x38] sm:$0xff] }
  0x10   :  { %400 = vmatprep.subr.mxu0 %v62_v15  ;;  %481 = vmatprep.subr.mxu1 %v62_v15  ;;  %v70_v46 = vld [vmem:[%s774_s0 + $0x100] sm:$0xff]  ;;  %v16_v47 = vld [vmem:[%s775_s1 + $0x10] sm:$0xff]  ;;  %v19_v49 = vld [vmem:[%s775_s1 + $0x28] sm:$0xff] }
  0x11   :  { %401 = vmatpush3.msra.mxu0 %v46_v16  ;;  %497 = vmatpush3.msra.mxu1 %v46_v16  ;;  %v20_v48 = vld [vmem:[%s775_s1 + $0x30] sm:$0xff]  ;;  %v22_v51 = vld [vmem:[%s775_s1 + $0x40] sm:$0xff]  ;;  %v75_v53 = vld [vmem:[%s776_s2 + $0x8] sm:$0xff] }
  0x12   :  { %402 = vmatprep.subr.mxu0 %v61_v17  ;;  %482 = vmatprep.subr.mxu1 %v61_v17  ;;  %v24_v50 = vld [vmem:[%s775_s1 + $0x50] sm:$0xff]  ;;  %v23_v54 = vld [vmem:[%s775_s1 + $0x48] sm:$0xff]  ;;  %v25_v55 = vld [vmem:[%s775_s1 + $0x58] sm:$0xff] }
  0x13   :  { %403 = vmatpush3.msra.mxu0 %v45_v18  ;;  %498 = vmatpush3.msra.mxu1 %v45_v18  ;;  %v76_v52 = vld [vmem:[%s776_s2 + $0x10] sm:$0xff]  ;;  %v27_v56 = vld [vmem:[%s775_s1 + $0x68] sm:$0xff]  ;;  %v77_v58 = vld [vmem:[%s776_s2 + $0x18] sm:$0xff] }
  0x14   :  { %404 = vmatprep.subr.mxu0 %v60_v19  ;;  %483 = vmatprep.subr.mxu1 %v60_v19  ;;  %v28_v57 = vld [vmem:[%s775_s1 + $0x70] sm:$0xff]  ;;  %v78_v59 = vld [vmem:[%s776_s2 + $0x20] sm:$0xff]  ;;  %v31_v61 = vld [vmem:[%s775_s1 + $0x88] sm:$0xff] }
  0x15   :  { %405 = vmatpush3.msra.mxu0 %v44_v20  ;;  %499 = vmatpush3.msra.mxu1 %v44_v20  ;;  %v26_v60 = vld [vmem:[%s775_s1 + $0x60] sm:$0xff]  ;;  %v79_v0 = vld [vmem:[%s776_s2 + $0x28] sm:$0xff]  ;;  %v80_v1 = vld [vmem:[%s776_s2 + $0x30] sm:$0xff] }
  0x16   :  { %406 = vmatprep.subr.mxu0 %v59_v21  ;;  %484 = vmatprep.subr.mxu1 %v59_v21  ;;  %v30_v62 = vld [vmem:[%s775_s1 + $0x80] sm:$0xff]  ;;  %v29_v2 = vld [vmem:[%s775_s1 + $0x78] sm:$0xff] }
  0x17   :  { %407 = vmatpush3.msra.mxu0 %v43_v22  ;;  %500 = vmatpush3.msra.mxu1 %v43_v22  ;;  %v34_v63 = vld [vmem:[%s775_s1 + $0xa0] sm:$0xff]  ;;  %v37_v3 = vld [vmem:[%s775_s1 + $0xb8] sm:$0xff] }
  0x18   :  { %408 = vmatprep.subr.mxu0 %v58_v23  ;;  %485 = vmatprep.subr.mxu1 %v58_v23  ;;  %v81_v4 = vld [vmem:[%s776_s2 + $0x38] sm:$0xff] }
  0x19   :  { %409 = vmatpush3.msra.mxu0 %v42_v24  ;;  %501 = vmatpush3.msra.mxu1 %v42_v24 }
  0x1a   :  { %410 = vmatprep.subr.mxu0 %v57_v25  ;;  %486 = vmatprep.subr.mxu1 %v57_v25 }
  0x1b   :  { %411 = vmatpush3.msra.mxu0 %v41_v26  ;;  %502 = vmatpush3.msra.mxu1 %v41_v26 }
  0x1c   :  { %412 = vmatprep.subr.mxu0 %v56_v27  ;;  %487 = vmatprep.subr.mxu1 %v56_v27 }
  0x1d   :  { %413 = vmatpush3.msra.mxu0 %v40_v28  ;;  %503 = vmatpush3.msra.mxu1 %v40_v28 }
  0x1e   :  { %414 = vmatprep.subr.mxu0 %v55_v29  ;;  %488 = vmatprep.subr.mxu1 %v55_v29 }
  0x1f   :  { %415 = vmatpush3.msra.mxu0 %v39_v30  ;;  %504 = vmatpush3.msra.mxu1 %v39_v30 }
  0x20   :  { %416 = vmatprep.subr.mxu0 %v54_v31  ;;  %489 = vmatprep.subr.mxu1 %v54_v31 }
  0x21   :  { %417 = vmatpush3.msra.mxu0 %v38_v32  ;;  %505 = vmatpush3.msra.mxu1 %v38_v32 }
  0x22   :  { %211 = vmatprep.mubr.f32.mxu0 %v15_v33  ;;  %241 = vmatprep.mubr.f32.mxu1 %v33_v34 }
  0x23   :  { %212 = vmatmul.mubr.f32.vlgmr.msra.gmra.mxu0 %v14_v35  ;;  %242 = vmatmul.mubr.f32.vlgmr.msra.gmra.mxu1 %v32_v36 }
  0x24   :  { %454 = vmatprep.subr.mxu1 %v73_v37  ;;  %216 = vmatprep.mubr.f32.mxu0 %v18_v38 }
  0x25   :  { %455 = vmatpush3.msra.mxu1 %v73_v37  ;;  %246 = vmatprep.mubr.f32.mxu1 %v36_v39 }
  0x26   :  { %456 = vmatprep.subr.mxu1 %v72_v40  ;;  %84 = vperm.xlu0 %507, %v74_v41  }
  0x27   :  { %457 = vmatpush3.msra.mxu1 %v72_v40  ;;  %217 = vmatmul.mubr.f32.gmra.mxu0 %v17_v42 }
  0x28   :  { %247 = vmatmul.mubr.f32.gmra.mxu1 %v35_v43  ;;  %458 = vmatprep.subr.mxu1 %v71_v44 }
  0x29   :  { %459 = vmatpush3.msra.mxu1 %v71_v44  ;;  %221 = vmatprep.mubr.f32.mxu0 %v21_v45 }
  0x2a   :  { %460 = vmatprep.subr.mxu1 %v70_v46  ;;  %462 = vmatprep.mubr.msk.f32.mxu1 %vm122_vm0, %v16_v47 }
  0x2b   :  { %461 = vmatpush3.msra.mxu1 %v70_v46  ;;  %222 = vmatmul.mubr.f32.gmra.mxu0 %v20_v48 }
  0x2c   :  { %463 = vmatmul.mubr.msk.f32.vlgmr.msra.gmra.mxu1 %vm122_vm0, %v19_v49  ;;  %226 = vmatprep.mubr.f32.mxu0 %v24_v50 }
  0x2d   :  { %465 = vmatprep.mubr.msk.f32.mxu1 %vm122_vm0, %v22_v51  ;;  %94 = vperm.xlu1 %508, %v76_v52  }
  0x2e   :  { %89 = vperm.xlu0 %507, %v75_v53  }
  0x2f   :  { %227 = vmatmul.mubr.f32.gmra.mxu0 %v23_v54 }
  0x30   :  { %466 = vmatmul.mubr.msk.f32.gmra.mxu1 %vm122_vm0, %v25_v55  ;;  %231 = vmatprep.mubr.f32.mxu0 %v27_v56 }
  0x31   :  { %468 = vmatprep.mubr.msk.f32.mxu1 %vm122_vm0, %v28_v57  ;;  %99 = vperm.xlu1 %508, %v77_v58  }
  0x32   :  { %104 = vperm.xlu0 %507, %v78_v59  }
  0x33   :  { %232 = vmatmul.mubr.f32.gmra.mxu0 %v26_v60 }
  0x34   :  { %469 = vmatmul.mubr.msk.f32.gmra.mxu1 %vm122_vm0, %v31_v61  ;;  %236 = vmatprep.mubr.f32.mxu0 %v30_v62 }
  0x35   :  { %471 = vmatprep.mubr.msk.f32.mxu1 %vm122_vm0, %v34_v63  ;;  %109 = vperm.xlu1 %508, %v79_v0  }
  0x36   :  { %114 = vperm.xlu0 %507, %v80_v1  }
  0x37   :  { %237 = vmatmul.mubr.f32.gmra.mxu0 %v29_v2 }
  0x38   :  { %472 = vmatmul.mubr.msk.f32.gmra.mxu1 %vm122_vm0, %v37_v3 }
  0x39   :  { %119 = vperm.xlu1 %508, %v81_v4  }
  0xa1   :  { %v85_v8 = vpop.permute.xlu0 %84 }
  0xa8   :  { %v95_v5 = vpop.permute.xlu1 %94 }
  0xa9   :  { %v90_v16 = vpop.permute.xlu0 %89 }
  0xac   :  { %v100_v12 = vpop.permute.xlu1 %99 }
  0xad   :  { %v105_v30 = vpop.permute.xlu0 %104 }
  0xb0   :  { %v110_v24 = vpop.permute.xlu1 %109 }
  0xb1   :  { %v115_v47 = vpop.permute.xlu0 %114 }
  0xb4   :  { %v120_v41 = vpop.permute.xlu1 %119 }
  0xe3   :  { %v418_v6 = vpop.f32.mrf.mxu0  ;;  %v436_v7 = vpop.f32.mrf.mxu1 }
  0xe5   :  { %v419_v9 = vpop.f32.mrf.mxu0  ;;  %v437_v10 = vpop.f32.mrf.mxu1 }
  0xe6   :  { %v420_v14 = vadd.f32 %v419_v9, %v418_v6  ;;  %v438_v44 = vadd.f32 %v437_v10, %v436_v7 }
  0xe7   :  { %v421_v11 = vpop.f32.mrf.mxu0 }
  0xe8   :  { %v439_v13 = vpop.f32.mrf.mxu1  ;;  %v214_v23 = vadd.f32 %v420_v14, %v85_v8  ;;  %v244_v56 = vadd.f32 %v438_v44, %v115_v47 }
  0xe9   :  { %v422_v15 = vpop.f32.mrf.mxu0 }
  0xea   :  { %v423_v17 = vadd.f32 %v422_v15, %v421_v11  ;;  %v440_v18 = vpop.f32.mrf.mxu1 }
  0xeb   :  { %v424_v19 = vpop.f32.mrf.mxu0  ;;  %v441_v38 = vadd.f32 %v440_v18, %v439_v13 }
  0xec   :  { %v219_v20 = vadd.f32 %v423_v17, %v90_v16  ;;  %v464_v21 = vpop.f32.mrf.mxu1 }
  0xed   :  { %v425_v22 = vpop.f32.mrf.mxu0  ;;  %v249_v51 = vadd.f32 %v441_v38, %v120_v41 }
  0xee   :  { %v324_v25 = vadd.f32 %v464_v21, %v219_v20  ;;  %v426_v26 = vadd.f32 %v425_v22, %v424_v19  ;;  %v318_v27 = vpop.f32.mrf.mxu1 }
  0xef   :  { %v319_v28 = vadd.f32 %v318_v27, %v214_v23  ;;  %v427_v29 = vpop.f32.mrf.mxu0 }
  0xf0   :  { %v358_v31 = vmax.f32 %v324_v25, 0.0  ;;  %v467_v32 = vpop.f32.mrf.mxu1  ;;  %v224_v33 = vadd.f32 %v426_v26, %v95_v5 }
  0xf1   :  { %v357_v34 = vmax.f32 %v319_v28, 0.0  ;;  %v428_v35 = vpop.f32.mrf.mxu0 }
  0xf2   :  { %367 = vst.msk [vmem:[%s777_s3 + $0x8] sm:$0xff] %vm365_vm1, %v358_v31  ;;  %v429_v36 = vadd.f32 %v428_v35, %v427_v29  ;;  %v328_v37 = vpop.f32.mrf.mxu1 }
  0xf3   :  { %366 = vst.msk [vmem:[%s777_s3] sm:$0xff] %vm365_vm1, %v357_v34  ;;  %v329_v39 = vadd.f32 %v328_v37, %v224_v33  ;;  %v430_v40 = vpop.f32.mrf.mxu0 }
  0xf4   :  { %v229_v42 = vadd.f32 %v429_v36, %v100_v12  ;;  %v470_v43 = vpop.f32.mrf.mxu1 }
  0xf5   :  { %v359_v45 = vmax.f32 %v329_v39, 0.0  ;;  %v431_v46 = vpop.f32.mrf.mxu0 }
  0xf6   :  { %v334_v48 = vadd.f32 %v467_v32, %v229_v42  ;;  %v432_v49 = vadd.f32 %v431_v46, %v430_v40  ;;  %v338_v50 = vpop.f32.mrf.mxu1 }
  0xf7   :  { %368 = vst.msk [vmem:[%s777_s3 + $0x10] sm:$0xff] %vm365_vm1, %v359_v45  ;;  %v433_v52 = vpop.f32.mrf.mxu0 }
  0xf8   :  { %v360_v53 = vmax.f32 %v334_v48, 0.0  ;;  %v234_v54 = vadd.f32 %v432_v49, %v105_v30  ;;  %v473_v55 = vpop.f32.mrf.mxu1 }
  0xf9   :  { %v354_v57 = vadd.f32 %v473_v55, %v249_v51  ;;  %v434_v58 = vpop.f32.mrf.mxu0 }
  0xfa   :  { %369 = vst.msk [vmem:[%s777_s3 + $0x18] sm:$0xff] %vm365_vm1, %v360_v53  ;;  %v339_v59 = vadd.f32 %v338_v50, %v234_v54  ;;  %v435_v60 = vadd.f32 %v434_v58, %v433_v52  ;;  %v348_v61 = vpop.f32.mrf.mxu1 }
  0xfb   :  { %v364_v62 = vmax.f32 %v354_v57, 0.0  ;;  %v349_v63 = vadd.f32 %v348_v61, %v244_v56 }
  0xfc   :  { %v361_v0 = vmax.f32 %v339_v59, 0.0  ;;  %v239_v1 = vadd.f32 %v435_v60, %v110_v24 }
  0xfd   :  { %373 = vst.msk [vmem:[%s777_s3 + $0x38] sm:$0xff] %vm365_vm1, %v364_v62  ;;  %v363_v2 = vmax.f32 %v349_v63, 0.0 }
  0xfe   :  { %370 = vst.msk [vmem:[%s777_s3 + $0x20] sm:$0xff] %vm365_vm1, %v361_v0  ;;  %v344_v3 = vadd.f32 %v470_v43, %v239_v1 }
  0xff   :  { %372 = vst.msk [vmem:[%s777_s3 + $0x30] sm:$0xff] %vm365_vm1, %v363_v2 }
 0x100   :  { %v362_v4 = vmax.f32 %v344_v3, 0.0 }
 0x102   :  { %371 = vst.msk [vmem:[%s777_s3 + $0x28] sm:$0xff] %vm365_vm1, %v362_v4 }

// kernel: _lambda_.14
= control target key start
LH: loop header
LB: loop body
LE: loop exit
PB: predicated region body
PF: predicated region fallthrough
CT: control target
= control target key end

     0   :  { %v737_v3 = vmov 0   ;;  %vm177_vm0 = vcmask 523264   ;;  %vm541_vm1 = vcmask 64512   ;;  %s1190_s0 = inlined_call_operand.vmem [shape: f32[576,8], index: 0, kind: input, shape index: {}]   ;;  %s1191_s1 = inlined_call_operand.vmem [shape: f32[64,576], index: 1, kind: input, shape index: {}]   ;;  %s1192_s2 = inlined_call_operand.vmem [shape: f32[64,1], index: 2, kind: input, shape index: {}]   ;;  %s1193_s3 = inlined_call_operand.vmem [shape: f32[64,8], index: 3, kind: input, shape index: {}]   ;;  %s1194_s4 = inlined_call_operand.vmem [shape: f32[64,8], index: 4, kind: output, shape index: {}]  }
   0x1   :  { %v88_v0 = vld [vmem:[%s1190_s0 + $0xf8] sm:$0xff]  ;;  %735 = vset.pattern.permute.xlu0 %v737_v3  ;;  %736 = vset.pattern.permute.xlu1 %v737_v3  ;;  %v87_v5 = vld [vmem:[%s1190_s0 + $0xf0] sm:$0xff]  ;;  %v86_v9 = vld [vmem:[%s1190_s0 + $0xe8] sm:$0xff] }
   0x2   :  { %v120_v1 = vld [vmem:[%s1190_s0 + $0x1f8] sm:$0xff]  ;;  %562 = vmatprep.subr.mxu0 %v88_v0  ;;  %v119_v6 = vld [vmem:[%s1190_s0 + $0x1f0] sm:$0xff]  ;;  %v118_v10 = vld [vmem:[%s1190_s0 + $0x1e8] sm:$0xff] }
   0x3   :  { %v72_v2 = vld [vmem:[%s1190_s0 + $0x78] sm:$0xff]  ;;  %618 = vmatprep.subr.mxu1 %v120_v1  ;;  %v71_v7 = vld [vmem:[%s1190_s0 + $0x70] sm:$0xff]  ;;  %v70_v11 = vld [vmem:[%s1190_s0 + $0x68] sm:$0xff] }
   0x4   :  { %v104_v4 = vld [vmem:[%s1190_s0 + $0x178] sm:$0xff]  ;;  %563 = vmatpush3.msra.mxu0 %v72_v2  ;;  %v103_v8 = vld [vmem:[%s1190_s0 + $0x170] sm:$0xff]  ;;  %v102_v12 = vld [vmem:[%s1190_s0 + $0x168] sm:$0xff] }
   0x5   :  { %619 = vmatpush3.msra.mxu1 %v104_v4  ;;  %564 = vmatprep.subr.mxu0 %v87_v5  ;;  %v85_v13 = vld [vmem:[%s1190_s0 + $0xe0] sm:$0xff]  ;;  %v84_v17 = vld [vmem:[%s1190_s0 + $0xd8] sm:$0xff]  ;;  %v83_v21 = vld [vmem:[%s1190_s0 + $0xd0] sm:$0xff] }
   0x6   :  { %620 = vmatprep.subr.mxu1 %v119_v6  ;;  %565 = vmatpush3.msra.mxu0 %v71_v7  ;;  %v117_v14 = vld [vmem:[%s1190_s0 + $0x1e0] sm:$0xff]  ;;  %v116_v18 = vld [vmem:[%s1190_s0 + $0x1d8] sm:$0xff]  ;;  %v115_v22 = vld [vmem:[%s1190_s0 + $0x1d0] sm:$0xff] }
   0x7   :  { %621 = vmatpush3.msra.mxu1 %v103_v8  ;;  %566 = vmatprep.subr.mxu0 %v86_v9  ;;  %v69_v15 = vld [vmem:[%s1190_s0 + $0x60] sm:$0xff]  ;;  %v68_v19 = vld [vmem:[%s1190_s0 + $0x58] sm:$0xff]  ;;  %v67_v23 = vld [vmem:[%s1190_s0 + $0x50] sm:$0xff] }
   0x8   :  { %622 = vmatprep.subr.mxu1 %v118_v10  ;;  %v101_v16 = vld [vmem:[%s1190_s0 + $0x160] sm:$0xff]  ;;  %567 = vmatpush3.msra.mxu0 %v70_v11  ;;  %v100_v20 = vld [vmem:[%s1190_s0 + $0x158] sm:$0xff]  ;;  %v99_v24 = vld [vmem:[%s1190_s0 + $0x150] sm:$0xff] }
   0x9   :  { %623 = vmatpush3.msra.mxu1 %v102_v12  ;;  %568 = vmatprep.subr.mxu0 %v85_v13  ;;  %v82_v25 = vld [vmem:[%s1190_s0 + $0xc8] sm:$0xff]  ;;  %v81_v29 = vld [vmem:[%s1190_s0 + $0xc0] sm:$0xff]  ;;  %v80_v33 = vld [vmem:[%s1190_s0 + $0xb8] sm:$0xff] }
   0xa   :  { %624 = vmatprep.subr.mxu1 %v117_v14  ;;  %569 = vmatpush3.msra.mxu0 %v69_v15  ;;  %v114_v26 = vld [vmem:[%s1190_s0 + $0x1c8] sm:$0xff]  ;;  %v113_v30 = vld [vmem:[%s1190_s0 + $0x1c0] sm:$0xff]  ;;  %v112_v34 = vld [vmem:[%s1190_s0 + $0x1b8] sm:$0xff] }
   0xb   :  { %625 = vmatpush3.msra.mxu1 %v101_v16  ;;  %570 = vmatprep.subr.mxu0 %v84_v17  ;;  %v66_v27 = vld [vmem:[%s1190_s0 + $0x48] sm:$0xff]  ;;  %v65_v31 = vld [vmem:[%s1190_s0 + $0x40] sm:$0xff]  ;;  %v64_v35 = vld [vmem:[%s1190_s0 + $0x38] sm:$0xff] }
   0xc   :  { %626 = vmatprep.subr.mxu1 %v116_v18  ;;  %571 = vmatpush3.msra.mxu0 %v68_v19  ;;  %v98_v28 = vld [vmem:[%s1190_s0 + $0x148] sm:$0xff]  ;;  %v97_v32 = vld [vmem:[%s1190_s0 + $0x140] sm:$0xff]  ;;  %v96_v36 = vld [vmem:[%s1190_s0 + $0x138] sm:$0xff] }
   0xd   :  { %627 = vmatpush3.msra.mxu1 %v100_v20  ;;  %572 = vmatprep.subr.mxu0 %v83_v21  ;;  %v79_v37 = vld [vmem:[%s1190_s0 + $0xb0] sm:$0xff]  ;;  %v78_v41 = vld [vmem:[%s1190_s0 + $0xa8] sm:$0xff]  ;;  %v77_v45 = vld [vmem:[%s1190_s0 + $0xa0] sm:$0xff] }
   0xe   :  { %628 = vmatprep.subr.mxu1 %v115_v22  ;;  %573 = vmatpush3.msra.mxu0 %v67_v23  ;;  %v111_v38 = vld [vmem:[%s1190_s0 + $0x1b0] sm:$0xff]  ;;  %v110_v42 = vld [vmem:[%s1190_s0 + $0x1a8] sm:$0xff]  ;;  %v109_v46 = vld [vmem:[%s1190_s0 + $0x1a0] sm:$0xff] }
   0xf   :  { %629 = vmatpush3.msra.mxu1 %v99_v24  ;;  %574 = vmatprep.subr.mxu0 %v82_v25  ;;  %v63_v39 = vld [vmem:[%s1190_s0 + $0x30] sm:$0xff]  ;;  %v62_v43 = vld [vmem:[%s1190_s0 + $0x28] sm:$0xff]  ;;  %v61_v47 = vld [vmem:[%s1190_s0 + $0x20] sm:$0xff] }
  0x10   :  { %630 = vmatprep.subr.mxu1 %v114_v26  ;;  %575 = vmatpush3.msra.mxu0 %v66_v27  ;;  %v95_v40 = vld [vmem:[%s1190_s0 + $0x130] sm:$0xff]  ;;  %v94_v44 = vld [vmem:[%s1190_s0 + $0x128] sm:$0xff]  ;;  %v93_v48 = vld [vmem:[%s1190_s0 + $0x120] sm:$0xff] }
  0x11   :  { %631 = vmatpush3.msra.mxu1 %v98_v28  ;;  %576 = vmatprep.subr.mxu0 %v81_v29  ;;  %v76_v49 = vld [vmem:[%s1190_s0 + $0x98] sm:$0xff]  ;;  %v75_v53 = vld [vmem:[%s1190_s0 + $0x90] sm:$0xff]  ;;  %v74_v57 = vld [vmem:[%s1190_s0 + $0x88] sm:$0xff] }
  0x12   :  { %632 = vmatprep.subr.mxu1 %v113_v30  ;;  %577 = vmatpush3.msra.mxu0 %v65_v31  ;;  %v108_v50 = vld [vmem:[%s1190_s0 + $0x198] sm:$0xff]  ;;  %v107_v54 = vld [vmem:[%s1190_s0 + $0x190] sm:$0xff]  ;;  %v106_v58 = vld [vmem:[%s1190_s0 + $0x188] sm:$0xff] }
  0x13   :  { %633 = vmatpush3.msra.mxu1 %v97_v32  ;;  %578 = vmatprep.subr.mxu0 %v80_v33  ;;  %v60_v51 = vld [vmem:[%s1190_s0 + $0x18] sm:$0xff]  ;;  %v59_v55 = vld [vmem:[%s1190_s0 + $0x10] sm:$0xff]  ;;  %v58_v59 = vld [vmem:[%s1190_s0 + $0x8] sm:$0xff] }
  0x14   :  { %634 = vmatprep.subr.mxu1 %v112_v34  ;;  %579 = vmatpush3.msra.mxu0 %v64_v35  ;;  %v92_v52 = vld [vmem:[%s1190_s0 + $0x118] sm:$0xff]  ;;  %v91_v56 = vld [vmem:[%s1190_s0 + $0x110] sm:$0xff]  ;;  %v90_v60 = vld [vmem:[%s1190_s0 + $0x108] sm:$0xff] }
  0x15   :  { %635 = vmatpush3.msra.mxu1 %v96_v36  ;;  %580 = vmatprep.subr.mxu0 %v79_v37  ;;  %v73_v61 = vld [vmem:[%s1190_s0 + $0x80] sm:$0xff]  ;;  %v18_v0 = vld [vmem:[%s1191_s1 + $0x8] sm:$0xff]  ;;  %v20_v2 = vld [vmem:[%s1191_s1 + $0x18] sm:$0xff] }
  0x16   :  { %636 = vmatprep.subr.mxu1 %v111_v38  ;;  %581 = vmatpush3.msra.mxu0 %v63_v39  ;;  %v105_v62 = vld [vmem:[%s1190_s0 + $0x180] sm:$0xff]  ;;  %v19_v4 = vld [vmem:[%s1191_s1 + $0x10] sm:$0xff]  ;;  %v128_v5 = vld [vmem:[%s1190_s0 + $0x238] sm:$0xff] }
  0x17   :  { %637 = vmatpush3.msra.mxu1 %v95_v40  ;;  %582 = vmatprep.subr.mxu0 %v78_v41  ;;  %v57_v63 = vld [vmem:[%s1190_s0] sm:$0xff]  ;;  %v23_v6 = vld [vmem:[%s1191_s1 + $0x30] sm:$0xff]  ;;  %v22_v8 = vld [vmem:[%s1191_s1 + $0x28] sm:$0xff] }
  0x18   :  { %638 = vmatprep.subr.mxu1 %v110_v42  ;;  %583 = vmatpush3.msra.mxu0 %v62_v43  ;;  %v89_v1 = vld [vmem:[%s1190_s0 + $0x100] sm:$0xff]  ;;  %v24_v9 = vld [vmem:[%s1191_s1 + $0x38] sm:$0xff]  ;;  %v127_v10 = vld [vmem:[%s1190_s0 + $0x230] sm:$0xff] }
  0x19   :  { %639 = vmatpush3.msra.mxu1 %v94_v44  ;;  %584 = vmatprep.subr.mxu0 %v77_v45  ;;  %v17_v3 = vld [vmem:[%s1191_s1] sm:$0xff]  ;;  %v28_v11 = vld [vmem:[%s1191_s1 + $0x58] sm:$0xff]  ;;  %v30_v12 = vld [vmem:[%s1191_s1 + $0x68] sm:$0xff] }
  0x1a   :  { %640 = vmatprep.subr.mxu1 %v109_v46  ;;  %585 = vmatpush3.msra.mxu0 %v61_v47  ;;  %v25_v7 = vld [vmem:[%s1191_s1 + $0x40] sm:$0xff]  ;;  %v27_v13 = vld [vmem:[%s1191_s1 + $0x50] sm:$0xff]  ;;  %v126_v15 = vld [vmem:[%s1190_s0 + $0x228] sm:$0xff] }
  0x1b   :  { %641 = vmatpush3.msra.mxu1 %v93_v48  ;;  %586 = vmatprep.subr.mxu0 %v76_v49  ;;  %v29_v14 = vld [vmem:[%s1191_s1 + $0x60] sm:$0xff]  ;;  %v35_v17 = vld [vmem:[%s1191_s1 + $0x90] sm:$0xff]  ;;  %v32_v18 = vld [vmem:[%s1191_s1 + $0x78] sm:$0xff] }
  0x1c   :  { %642 = vmatprep.subr.mxu1 %v108_v50  ;;  %587 = vmatpush3.msra.mxu0 %v60_v51  ;;  %v33_v16 = vld [vmem:[%s1191_s1 + $0x80] sm:$0xff]  ;;  %v34_v19 = vld [vmem:[%s1191_s1 + $0x88] sm:$0xff]  ;;  %v40_v22 = vld [vmem:[%s1191_s1 + $0xb8] sm:$0xff] }
  0x1d   :  { %643 = vmatpush3.msra.mxu1 %v92_v52  ;;  %588 = vmatprep.subr.mxu0 %v75_v53  ;;  %v125_v20 = vld [vmem:[%s1190_s0 + $0x220] sm:$0xff]  ;;  %v38_v21 = vld [vmem:[%s1191_s1 + $0xa8] sm:$0xff]  ;;  %v39_v24 = vld [vmem:[%s1191_s1 + $0xb0] sm:$0xff] }
  0x1e   :  { %644 = vmatprep.subr.mxu1 %v107_v54  ;;  %589 = vmatpush3.msra.mxu0 %v59_v55  ;;  %v37_v23 = vld [vmem:[%s1191_s1 + $0xa0] sm:$0xff]  ;;  %v124_v25 = vld [vmem:[%s1190_s0 + $0x218] sm:$0xff]  ;;  %v43_v26 = vld [vmem:[%s1191_s1 + $0xd0] sm:$0xff] }
  0x1f   :  { %645 = vmatpush3.msra.mxu1 %v91_v56  ;;  %590 = vmatprep.subr.mxu0 %v74_v57  ;;  %v45_v27 = vld [vmem:[%s1191_s1 + $0xe0] sm:$0xff]  ;;  %v42_v28 = vld [vmem:[%s1191_s1 + $0xc8] sm:$0xff]  ;;  %v44_v29 = vld [vmem:[%s1191_s1 + $0xd8] sm:$0xff] }
  0x20   :  { %646 = vmatprep.subr.mxu1 %v106_v58  ;;  %591 = vmatpush3.msra.mxu0 %v58_v59  ;;  %v123_v30 = vld [vmem:[%s1190_s0 + $0x210] sm:$0xff]  ;;  %v48_v31 = vld [vmem:[%s1191_s1 + $0xf8] sm:$0xff]  ;;  %v50_v32 = vld [vmem:[%s1191_s1 + $0x108] sm:$0xff] }
  0x21   :  { %647 = vmatpush3.msra.mxu1 %v90_v60  ;;  %592 = vmatprep.subr.mxu0 %v73_v61  ;;  %v47_v33 = vld [vmem:[%s1191_s1 + $0xf0] sm:$0xff]  ;;  %v49_v34 = vld [vmem:[%s1191_s1 + $0x100] sm:$0xff]  ;;  %v122_v35 = vld [vmem:[%s1190_s0 + $0x208] sm:$0xff] }
  0x22   :  { %648 = vmatprep.subr.mxu1 %v105_v62  ;;  %593 = vmatpush3.msra.mxu0 %v57_v63  ;;  %v53_v36 = vld [vmem:[%s1191_s1 + $0x120] sm:$0xff]  ;;  %v55_v37 = vld [vmem:[%s1191_s1 + $0x130] sm:$0xff]  ;;  %v52_v38 = vld [vmem:[%s1191_s1 + $0x118] sm:$0xff] }
  0x23   :  { %266 = vmatprep.mubr.f32.mxu0 %v18_v0  ;;  %649 = vmatpush3.msra.mxu1 %v89_v1  ;;  %v54_v39 = vld [vmem:[%s1191_s1 + $0x128] sm:$0xff]  ;;  %v121_v40 = vld [vmem:[%s1190_s0 + $0x200] sm:$0xff]  ;;  %v31_v45 = vld [vmem:[%s1191_s1 + $0x70] sm:$0xff] }
  0x24   :  { %371 = vmatprep.mubr.f32.mxu1 %v20_v2  ;;  %267 = vmatmul.mubr.f32.vlgmr.msra.gmra.mxu0 %v17_v3  ;;  %v21_v41 = vld [vmem:[%s1191_s1 + $0x20] sm:$0xff]  ;;  %v26_v43 = vld [vmem:[%s1191_s1 + $0x48] sm:$0xff]  ;;  %v51_v46 = vld [vmem:[%s1191_s1 + $0x110] sm:$0xff] }
  0x25   :  { %372 = vmatmul.mubr.f32.vlgmr.msra.gmra.mxu1 %v19_v4  ;;  %690 = vmatprep.subr.mxu0 %v128_v5  ;;  %v41_v42 = vld [vmem:[%s1191_s1 + $0xc0] sm:$0xff]  ;;  %v46_v44 = vld [vmem:[%s1191_s1 + $0xe8] sm:$0xff]  ;;  %v131_v48 = vld [vmem:[%s1192_s2 + $0x10] sm:$0xff] }
  0x26   :  { %718 = vmatprep.subr.mxu1 %v128_v5  ;;  %691 = vmatpush3.msra.mxu0 %v128_v5  ;;  %v129_v47 = vld [vmem:[%s1192_s2] sm:$0xff]  ;;  %v36_v49 = vld [vmem:[%s1191_s1 + $0x98] sm:$0xff]  ;;  %v130_v51 = vld [vmem:[%s1192_s2 + $0x8] sm:$0xff] }
  0x27   :  { %726 = vmatpush3.msra.mxu1 %v128_v5  ;;  %271 = vmatprep.mubr.f32.mxu0 %v23_v6  ;;  %v56_v50 = vld [vmem:[%s1191_s1 + $0x138] sm:$0xff]  ;;  %v134_v53 = vld [vmem:[%s1192_s2 + $0x28] sm:$0xff]  ;;  %v133_v54 = vld [vmem:[%s1192_s2 + $0x20] sm:$0xff] }
  0x28   :  { %376 = vmatprep.mubr.f32.mxu1 %v25_v7  ;;  %272 = vmatmul.mubr.f32.gmra.mxu0 %v22_v8  ;;  %v132_v52 = vld [vmem:[%s1192_s2 + $0x18] sm:$0xff]  ;;  %v135_v56 = vld [vmem:[%s1192_s2 + $0x30] sm:$0xff] }
  0x29   :  { %377 = vmatmul.mubr.f32.gmra.mxu1 %v24_v9  ;;  %692 = vmatprep.subr.mxu0 %v127_v10  ;;  %v136_v55 = vld [vmem:[%s1192_s2 + $0x38] sm:$0xff] }
  0x2a   :  { %719 = vmatprep.subr.mxu1 %v127_v10  ;;  %693 = vmatpush3.msra.mxu0 %v127_v10 }
  0x2b   :  { %727 = vmatpush3.msra.mxu1 %v127_v10  ;;  %276 = vmatprep.mubr.f32.mxu0 %v28_v11 }
  0x2c   :  { %381 = vmatprep.mubr.f32.mxu1 %v30_v12  ;;  %277 = vmatmul.mubr.f32.gmra.mxu0 %v27_v13 }
  0x2d   :  { %382 = vmatmul.mubr.f32.gmra.mxu1 %v29_v14  ;;  %694 = vmatprep.subr.mxu0 %v126_v15 }
  0x2e   :  { %720 = vmatprep.subr.mxu1 %v126_v15  ;;  %695 = vmatpush3.msra.mxu0 %v126_v15 }
  0x2f   :  { %728 = vmatpush3.msra.mxu1 %v126_v15  ;;  %281 = vmatprep.mubr.f32.mxu0 %v33_v16 }
  0x30   :  { %386 = vmatprep.mubr.f32.mxu1 %v35_v17  ;;  %282 = vmatmul.mubr.f32.gmra.mxu0 %v32_v18 }
  0x31   :  { %387 = vmatmul.mubr.f32.gmra.mxu1 %v34_v19  ;;  %696 = vmatprep.subr.mxu0 %v125_v20 }
  0x32   :  { %721 = vmatprep.subr.mxu1 %v125_v20  ;;  %697 = vmatpush3.msra.mxu0 %v125_v20 }
  0x33   :  { %729 = vmatpush3.msra.mxu1 %v125_v20  ;;  %286 = vmatprep.mubr.f32.mxu0 %v38_v21 }
  0x34   :  { %391 = vmatprep.mubr.f32.mxu1 %v40_v22  ;;  %287 = vmatmul.mubr.f32.gmra.mxu0 %v37_v23 }
  0x35   :  { %392 = vmatmul.mubr.f32.gmra.mxu1 %v39_v24  ;;  %698 = vmatprep.subr.mxu0 %v124_v25 }
  0x36   :  { %722 = vmatprep.subr.mxu1 %v124_v25  ;;  %699 = vmatpush3.msra.mxu0 %v124_v25 }
  0x37   :  { %730 = vmatpush3.msra.mxu1 %v124_v25  ;;  %291 = vmatprep.mubr.f32.mxu0 %v43_v26 }
  0x38   :  { %396 = vmatprep.mubr.f32.mxu1 %v45_v27  ;;  %292 = vmatmul.mubr.f32.gmra.mxu0 %v42_v28 }
  0x39   :  { %397 = vmatmul.mubr.f32.gmra.mxu1 %v44_v29  ;;  %700 = vmatprep.subr.mxu0 %v123_v30 }
  0x3a   :  { %723 = vmatprep.subr.mxu1 %v123_v30  ;;  %701 = vmatpush3.msra.mxu0 %v123_v30 }
  0x3b   :  { %731 = vmatpush3.msra.mxu1 %v123_v30  ;;  %296 = vmatprep.mubr.f32.mxu0 %v48_v31 }
  0x3c   :  { %401 = vmatprep.mubr.f32.mxu1 %v50_v32  ;;  %297 = vmatmul.mubr.f32.gmra.mxu0 %v47_v33 }
  0x3d   :  { %402 = vmatmul.mubr.f32.gmra.mxu1 %v49_v34  ;;  %702 = vmatprep.subr.mxu0 %v122_v35 }
  0x3e   :  { %724 = vmatprep.subr.mxu1 %v122_v35  ;;  %703 = vmatpush3.msra.mxu0 %v122_v35 }
  0x3f   :  { %732 = vmatpush3.msra.mxu1 %v122_v35  ;;  %301 = vmatprep.mubr.f32.mxu0 %v53_v36 }
  0x40   :  { %406 = vmatprep.mubr.f32.mxu1 %v55_v37  ;;  %302 = vmatmul.mubr.f32.gmra.mxu0 %v52_v38 }
  0x41   :  { %407 = vmatmul.mubr.f32.gmra.mxu1 %v54_v39  ;;  %704 = vmatprep.subr.mxu0 %v121_v40 }
  0x42   :  { %725 = vmatprep.subr.mxu1 %v121_v40  ;;  %705 = vmatpush3.msra.mxu0 %v121_v40 }
  0x43   :  { %733 = vmatpush3.msra.mxu1 %v121_v40  ;;  %706 = vmatprep.mubr.msk.f32.mxu0 %vm177_vm0, %v21_v41 }
  0x44   :  { %712 = vmatprep.mubr.msk.f32.mxu1 %vm177_vm0, %v41_v42  ;;  %707 = vmatmul.mubr.msk.f32.vlgmr.msra.gmra.mxu0 %vm177_vm0, %v26_v43 }
  0x45   :  { %713 = vmatmul.mubr.msk.f32.vlgmr.msra.gmra.mxu1 %vm177_vm0, %v46_v44  ;;  %709 = vmatprep.mubr.msk.f32.mxu0 %vm177_vm0, %v31_v45 }
  0x46   :  { %715 = vmatprep.mubr.msk.f32.mxu1 %vm177_vm0, %v51_v46  ;;  %139 = vperm.xlu0 %735, %v129_v47  }
  0x47   :  { %149 = vperm.xlu1 %736, %v131_v48  }
  0x48   :  { %710 = vmatmul.mubr.msk.f32.gmra.mxu0 %vm177_vm0, %v36_v49 }
  0x49   :  { %716 = vmatmul.mubr.msk.f32.gmra.mxu1 %vm177_vm0, %v56_v50 }
  0x4a   :  { %144 = vperm.xlu0 %735, %v130_v51  }
  0x4b   :  { %154 = vperm.xlu1 %736, %v132_v52  }
  0x4e   :  { %159 = vperm.xlu0 %735, %v133_v54  }
  0x4f   :  { %164 = vperm.xlu1 %736, %v134_v53  }
  0x52   :  { %169 = vperm.xlu0 %735, %v135_v56  }
  0x53   :  { %174 = vperm.xlu1 %736, %v136_v55   ;;  %v518_v55 = vld [vmem:[%s1193_s3 + $0x8] sm:$0xff] }
  0xc1   :  { %v140_v10 = vpop.permute.xlu0 %139 }
  0xc2   :  { %v150_v7 = vpop.permute.xlu1 %149 }
  0xc5   :  { %v145_v18 = vpop.permute.xlu0 %144 }
  0xc6   :  { %v155_v15 = vpop.permute.xlu1 %154 }
  0xc9   :  { %v160_v28 = vpop.permute.xlu0 %159 }
  0xca   :  { %v165_v27 = vpop.permute.xlu1 %164 }
  0xcd   :  { %v170_v47 = vpop.permute.xlu0 %169 }
  0xce   :  { %v175_v46 = vpop.permute.xlu1 %174 }
  0xe4   :  { %v594_v57 = vpop.f32.mrf.mxu0 }
  0xe5   :  { %v650_v58 = vpop.f32.mrf.mxu1 }
  0xe6   :  { %v595_v59 = vpop.f32.mrf.mxu0 }
  0xe7   :  { %v651_v60 = vpop.f32.mrf.mxu1  ;;  %v596_v23 = vadd.f32 %v595_v59, %v594_v57  ;;  %v522_v57 = vld [vmem:[%s1193_s3 + $0x28] sm:$0xff] }
  0xe8   :  { %v597_v61 = vpop.f32.mrf.mxu0  ;;  %v652_v42 = vadd.f32 %v651_v60, %v650_v58 }
  0xe9   :  { %v653_v62 = vpop.f32.mrf.mxu1  ;;  %v269_v33 = vadd.f32 %v596_v23, %v140_v10  ;;  %v521_v10 = vld [vmem:[%s1193_s3 + $0x20] sm:$0xff] }
  0xea   :  { %v598_v63 = vpop.f32.mrf.mxu0 }
  0xeb   :  { %v654_v0 = vpop.f32.mrf.mxu1  ;;  %v599_v21 = vadd.f32 %v598_v63, %v597_v61  ;;  %v374_v58 = vadd.f32 %v652_v42, %v269_v33 }
  0xec   :  { %v600_v1 = vpop.f32.mrf.mxu0  ;;  %v655_v39 = vadd.f32 %v654_v0, %v653_v62 }
  0xed   :  { %v1131_v2 = vpop.f32.mrf.mxu1  ;;  %v274_v31 = vadd.f32 %v599_v21, %v145_v18  ;;  %v520_v21 = vld [vmem:[%s1193_s3 + $0x18] sm:$0xff] }
  0xee   :  { %v601_v3 = vpop.f32.mrf.mxu0 }
  0xef   :  { %v657_v4 = vpop.f32.mrf.mxu1  ;;  %v602_v34 = vadd.f32 %v601_v3, %v600_v1  ;;  %v379_v49 = vadd.f32 %v655_v39, %v274_v31 }
  0xf0   :  { %v603_v5 = vpop.f32.mrf.mxu0  ;;  %v658_v63 = vadd.f32 %v657_v4, %v1131_v2 }
  0xf1   :  { %v659_v6 = vpop.f32.mrf.mxu1  ;;  %v279_v51 = vadd.f32 %v602_v34, %v150_v7  ;;  %v517_v7 = vld [vmem:[%s1193_s3] sm:$0xff] }
  0xf2   :  { %v604_v8 = vpop.f32.mrf.mxu0 }
  0xf3   :  { %v660_v9 = vpop.f32.mrf.mxu1  ;;  %v605_v35 = vadd.f32 %v604_v8, %v603_v5 }
  0xf4   :  { %v606_v11 = vpop.f32.mrf.mxu0  ;;  %v661_v0 = vadd.f32 %v660_v9, %v659_v6  ;;  %v384_v6 = vadd.f32 %v658_v63, %v279_v51 }
  0xf5   :  { %v662_v12 = vpop.f32.mrf.mxu1  ;;  %v284_v52 = vadd.f32 %v605_v35, %v155_v15 }
  0xf6   :  { %v607_v13 = vpop.f32.mrf.mxu0 }
  0xf7   :  { %v663_v14 = vpop.f32.mrf.mxu1  ;;  %v608_v26 = vadd.f32 %v607_v13, %v606_v11  ;;  %v389_v15 = vadd.f32 %v661_v0, %v284_v52 }
  0xf8   :  { %v609_v16 = vpop.f32.mrf.mxu0  ;;  %v664_v45 = vadd.f32 %v663_v14, %v662_v12 }
  0xf9   :  { %v665_v17 = vpop.f32.mrf.mxu1  ;;  %v289_v40 = vadd.f32 %v608_v26, %v160_v28  ;;  %v519_v26 = vld [vmem:[%s1193_s3 + $0x10] sm:$0xff] }
  0xfa   :  { %v610_v19 = vpop.f32.mrf.mxu0  ;;  %v523_v28 = vld [vmem:[%s1193_s3 + $0x30] sm:$0xff] }
  0xfb   :  { %v666_v20 = vpop.f32.mrf.mxu1  ;;  %v611_v22 = vadd.f32 %v610_v19, %v609_v16  ;;  %v394_v62 = vadd.f32 %v664_v45, %v289_v40 }
  0xfc   :  { %v612_v24 = vpop.f32.mrf.mxu0  ;;  %v667_v41 = vadd.f32 %v666_v20, %v665_v17 }
  0xfd   :  { %v668_v25 = vpop.f32.mrf.mxu1  ;;  %v294_v32 = vadd.f32 %v611_v22, %v165_v27  ;;  %v524_v22 = vld [vmem:[%s1193_s3 + $0x38] sm:$0xff] }
  0xfe   :  { %v613_v29 = vpop.f32.mrf.mxu0 }
  0xff   :  { %v669_v30 = vpop.f32.mrf.mxu1  ;;  %v614_v36 = vadd.f32 %v613_v29, %v612_v24  ;;  %v399_v50 = vadd.f32 %v667_v41, %v294_v32 }
 0x100   :  { %v615_v37 = vpop.f32.mrf.mxu0  ;;  %v670_v1 = vadd.f32 %v669_v30, %v668_v25 }
 0x101   :  { %v671_v38 = vpop.f32.mrf.mxu1  ;;  %v299_v53 = vadd.f32 %v614_v36, %v170_v47 }
 0x102   :  { %v616_v43 = vpop.f32.mrf.mxu0 }
 0x103   :  { %v672_v44 = vpop.f32.mrf.mxu1  ;;  %v617_v48 = vadd.f32 %v616_v43, %v615_v37  ;;  %v404_v9 = vadd.f32 %v670_v1, %v299_v53 }
 0x104   :  { %v708_v54 = vpop.f32.mrf.mxu0  ;;  %v673_v3 = vadd.f32 %v672_v44, %v671_v38 }
 0x105   :  { %v714_v56 = vpop.f32.mrf.mxu1  ;;  %v304_v59 = vadd.f32 %v617_v48, %v175_v46  ;;  %v484_v60 = vadd.f32 %v708_v54, %v379_v49 }
 0x106   :  { %v504_v61 = vadd.f32 %v714_v56, %v399_v50  ;;  %v478_v5 = vpop.f32.mrf.mxu0 }
 0x107   :  { %v498_v8 = vpop.f32.mrf.mxu1  ;;  %v526_v11 = vadd.f32 %v518_v55, %v484_v60  ;;  %v479_v13 = vadd.f32 %v478_v5, %v374_v58  ;;  %v409_v2 = vadd.f32 %v673_v3, %v304_v59 }
 0x108   :  { %v530_v12 = vadd.f32 %v522_v57, %v504_v61  ;;  %v499_v14 = vadd.f32 %v498_v8, %v394_v62  ;;  %v711_v16 = vpop.f32.mrf.mxu0 }
 0x109   :  { %v717_v4 = vpop.f32.mrf.mxu1  ;;  %v534_v17 = vmax.f32 %v526_v11, 0.0  ;;  %v525_v19 = vadd.f32 %v517_v7, %v479_v13  ;;  %v494_v23 = vadd.f32 %v711_v16, %v389_v15 }
 0x10a   :  { %v538_v18 = vmax.f32 %v530_v12, 0.0  ;;  %v529_v20 = vadd.f32 %v521_v10, %v499_v14  ;;  %v514_v24 = vadd.f32 %v717_v4, %v409_v2  ;;  %v488_v25 = vpop.f32.mrf.mxu0 }
 0x10b   :  { %v508_v27 = vpop.f32.mrf.mxu1  ;;  %543 = vst.msk [vmem:[%s1194_s4 + $0x8] sm:$0xff] %vm541_vm1, %v534_v17  ;;  %v533_v29 = vmax.f32 %v525_v19, 0.0  ;;  %v489_v31 = vadd.f32 %v488_v25, %v384_v6  ;;  %v528_v33 = vadd.f32 %v520_v21, %v494_v23 }
 0x10c   :  { %547 = vst.msk [vmem:[%s1194_s4 + $0x28] sm:$0xff] %vm541_vm1, %v538_v18  ;;  %v537_v30 = vmax.f32 %v529_v20, 0.0  ;;  %v509_v32 = vadd.f32 %v508_v27, %v404_v9  ;;  %v532_v34 = vadd.f32 %v524_v22, %v514_v24 }
 0x10d   :  { %542 = vst.msk [vmem:[%s1194_s4] sm:$0xff] %vm541_vm1, %v533_v29  ;;  %v527_v35 = vadd.f32 %v519_v26, %v489_v31  ;;  %v536_v37 = vmax.f32 %v528_v33, 0.0 }
 0x10e   :  { %546 = vst.msk [vmem:[%s1194_s4 + $0x20] sm:$0xff] %vm541_vm1, %v537_v30  ;;  %v531_v36 = vadd.f32 %v523_v28, %v509_v32  ;;  %v540_v38 = vmax.f32 %v532_v34, 0.0 }
 0x10f   :  { %v535_v39 = vmax.f32 %v527_v35, 0.0  ;;  %545 = vst.msk [vmem:[%s1194_s4 + $0x18] sm:$0xff] %vm541_vm1, %v536_v37 }
 0x110   :  { %v539_v40 = vmax.f32 %v531_v36, 0.0  ;;  %549 = vst.msk [vmem:[%s1194_s4 + $0x38] sm:$0xff] %vm541_vm1, %v540_v38 }
 0x111   :  { %544 = vst.msk [vmem:[%s1194_s4 + $0x10] sm:$0xff] %vm541_vm1, %v535_v39 }
 0x112   :  { %548 = vst.msk [vmem:[%s1194_s4 + $0x30] sm:$0xff] %vm541_vm1, %v539_v40 }

// kernel: _lambda_.15
= control target key start
LH: loop header
LB: loop body
LE: loop exit
PB: predicated region body
PF: predicated region fallthrough
CT: control target
= control target key end

     0   :  { %vm78_vm0 = vcmask 25600   ;;  %vm743_vm1 = vcmask 523264   ;;  %vm672_vm2 = vcmask 1041409   ;;  %vm674_vm3 = vcmask 1042434   ;;  %s1445_s0 = inlined_call_operand.vmem [shape: f32[64,2,4], index: 0, kind: input, shape index: {}]   ;;  %s1446_s1 = inlined_call_operand.vmem [shape: f32[10,64], index: 1, kind: input, shape index: {}]   ;;  %s1447_s2 = inlined_call_operand.vmem [shape: f32[10,1], index: 2, kind: input, shape index: {}]   ;;  %s1448_s3 = inlined_call_operand.vmem [shape: f32[10,2], index: 3, kind: output, shape index: {}]  }
   0x1   :  { %v72_v0 = vld [vmem:[%s1445_s0 + $0x74] sm:$0x3]  ;;  %v70_v1 = vld [vmem:[%s1445_s0 + $0x70] sm:$0x3]  ;;  %v71_v2 = vld [vmem:[%s1445_s0 + $0x72] sm:$0x3] }
   0x2   :  { %v253_v3 = vsel %vm78_vm0, %v72_v0, 0.0  ;;  %v247_v4 = vsel %vm78_vm0, %v70_v1, 0.0  ;;  %v62_v5 = vld [vmem:[%s1445_s0 + $0x60] sm:$0x3]  ;;  %v250_v6 = vsel %vm78_vm0, %v71_v2, 0.0  ;;  %vm676_vm4 = vcmask 1043459  }
   0x3   :  { %254 = vadd.xlane.f32.xlu1 %v253_v3  ;;  %248 = vadd.xlane.f32.xlu0 %v247_v4  ;;  %v223_v7 = vsel %vm78_vm0, %v62_v5, 0.0  ;;  %v63_v8 = vld [vmem:[%s1445_s0 + $0x62] sm:$0x3]  ;;  %v73_v9 = vld [vmem:[%s1445_s0 + $0x76] sm:$0x3]  ;;  %vm678_vm5 = vcmask 1044484  }
   0x4   :  { %v226_v10 = vsel %vm78_vm0, %v63_v8, 0.0  ;;  %v256_v11 = vsel %vm78_vm0, %v73_v9, 0.0  ;;  %v64_v12 = vld [vmem:[%s1445_s0 + $0x64] sm:$0x3]  ;;  %v74_v13 = vld [vmem:[%s1445_s0 + $0x78] sm:$0x3] }
   0x5   :  { %v229_v14 = vsel %vm78_vm0, %v64_v12, 0.0  ;;  %v259_v15 = vsel %vm78_vm0, %v74_v13, 0.0  ;;  %v55_v16 = vld [vmem:[%s1445_s0 + $0x52] sm:$0x3]  ;;  %v54_v17 = vld [vmem:[%s1445_s0 + $0x50] sm:$0x3] }
   0x6   :  { %v75_v18 = vld [vmem:[%s1445_s0 + $0x7a] sm:$0x3]  ;;  %v65_v19 = vld [vmem:[%s1445_s0 + $0x66] sm:$0x3]  ;;  %v66_v20 = vld [vmem:[%s1445_s0 + $0x68] sm:$0x3] }
   0x7   :  { %251 = vadd.xlane.f32.xlu0 %v250_v6  ;;  %224 = vadd.xlane.f32.xlu1 %v223_v7  ;;  %v56_v21 = vld [vmem:[%s1445_s0 + $0x54] sm:$0x3]  ;;  %v76_v22 = vld [vmem:[%s1445_s0 + $0x7c] sm:$0x3]  ;;  %v46_v23 = vld [vmem:[%s1445_s0 + $0x40] sm:$0x3] }
   0x8   :  { %v47_v24 = vld [vmem:[%s1445_s0 + $0x42] sm:$0x3]  ;;  %v57_v25 = vld [vmem:[%s1445_s0 + $0x56] sm:$0x3]  ;;  %v202_v26 = vsel %vm78_vm0, %v55_v16, 0.0  ;;  %v199_v27 = vsel %vm78_vm0, %v54_v17, 0.0 }
   0x9   :  { %v262_v28 = vsel %vm78_vm0, %v75_v18, 0.0  ;;  %v232_v29 = vsel %vm78_vm0, %v65_v19, 0.0  ;;  %v235_v30 = vsel %vm78_vm0, %v66_v20, 0.0  ;;  %v205_v31 = vsel %vm78_vm0, %v56_v21, 0.0  ;;  %v31_v36 = vld [vmem:[%s1445_s0 + $0x22] sm:$0x3] }
   0xa   :  { %v957_v32 = vsel %vm78_vm0, %v76_v22, 0.0  ;;  %v960_v33 = vsel %vm78_vm0, %v46_v23, 0.0  ;;  %v963_v34 = vsel %vm78_vm0, %v47_v24, 0.0  ;;  %v966_v35 = vsel %vm78_vm0, %v57_v25, 0.0  ;;  %v41_v37 = vld [vmem:[%s1445_s0 + $0x36] sm:$0x3] }
   0xb   :  { %227 = vadd.xlane.f32.xlu0 %v226_v10  ;;  %257 = vadd.xlane.f32.xlu1 %v256_v11  ;;  %v975_v38 = vsel %vm78_vm0, %v31_v36, 0.0  ;;  %v978_v39 = vsel %vm78_vm0, %v41_v37, 0.0  ;;  %v51_v40 = vld [vmem:[%s1445_s0 + $0x4a] sm:$0x3]  ;;  %v61_v41 = vld [vmem:[%s1445_s0 + $0x5e] sm:$0x3] }
   0xc   :  { %v987_v42 = vsel %vm78_vm0, %v51_v40, 0.0  ;;  %v990_v43 = vsel %vm78_vm0, %v61_v41, 0.0  ;;  %v32_v44 = vld [vmem:[%s1445_s0 + $0x24] sm:$0x3]  ;;  %v42_v45 = vld [vmem:[%s1445_s0 + $0x38] sm:$0x3] }
   0xd   :  { %v999_v46 = vsel %vm78_vm0, %v32_v44, 0.0  ;;  %v1002_v47 = vsel %vm78_vm0, %v42_v45, 0.0  ;;  %v52_v48 = vld [vmem:[%s1445_s0 + $0x4c] sm:$0x3]  ;;  %v22_v49 = vld [vmem:[%s1445_s0 + $0x10] sm:$0x3] }
   0xe   :  { %v1011_v50 = vsel %vm78_vm0, %v52_v48, 0.0  ;;  %v1014_v51 = vsel %vm78_vm0, %v22_v49, 0.0  ;;  %v23_v52 = vld [vmem:[%s1445_s0 + $0x12] sm:$0x3]  ;;  %v33_v53 = vld [vmem:[%s1445_s0 + $0x26] sm:$0x3] }
   0xf   :  { %230 = vadd.xlane.f32.xlu0 %v229_v14  ;;  %260 = vadd.xlane.f32.xlu1 %v259_v15  ;;  %v1023_v54 = vsel %vm78_vm0, %v23_v52, 0.0  ;;  %v1026_v55 = vsel %vm78_vm0, %v33_v53, 0.0  ;;  %v43_v56 = vld [vmem:[%s1445_s0 + $0x3a] sm:$0x3]  ;;  %v53_v57 = vld [vmem:[%s1445_s0 + $0x4e] sm:$0x3] }
  0x10   :  { %v1035_v58 = vsel %vm78_vm0, %v43_v56, 0.0  ;;  %v1038_v59 = vsel %vm78_vm0, %v53_v57, 0.0  ;;  %v24_v60 = vld [vmem:[%s1445_s0 + $0x14] sm:$0x3]  ;;  %v34_v61 = vld [vmem:[%s1445_s0 + $0x28] sm:$0x3] }
  0x11   :  { %v1047_v62 = vsel %vm78_vm0, %v24_v60, 0.0  ;;  %v1050_v63 = vsel %vm78_vm0, %v34_v61, 0.0  ;;  %v44_v0 = vld [vmem:[%s1445_s0 + $0x3c] sm:$0x3]  ;;  %v14_v1 = vld [vmem:[%s1445_s0] sm:$0x3] }
  0x12   :  { %v1059_v2 = vsel %vm78_vm0, %v44_v0, 0.0  ;;  %v1062_v3 = vsel %vm78_vm0, %v14_v1, 0.0  ;;  %v15_v4 = vld [vmem:[%s1445_s0 + $0x2] sm:$0x3]  ;;  %v25_v5 = vld [vmem:[%s1445_s0 + $0x16] sm:$0x3] }
  0x13   :  { %203 = vadd.xlane.f32.xlu1 %v202_v26  ;;  %200 = vadd.xlane.f32.xlu0 %v199_v27  ;;  %v1071_v6 = vsel %vm78_vm0, %v15_v4, 0.0  ;;  %v1074_v7 = vsel %vm78_vm0, %v25_v5, 0.0  ;;  %v35_v8 = vld [vmem:[%s1445_s0 + $0x2a] sm:$0x3]  ;;  %v45_v9 = vld [vmem:[%s1445_s0 + $0x3e] sm:$0x3] }
  0x14   :  { %v1083_v10 = vsel %vm78_vm0, %v35_v8, 0.0  ;;  %v1086_v11 = vsel %vm78_vm0, %v45_v9, 0.0  ;;  %v16_v12 = vld [vmem:[%s1445_s0 + $0x4] sm:$0x3]  ;;  %v26_v13 = vld [vmem:[%s1445_s0 + $0x18] sm:$0x3] }
  0x15   :  { %v1095_v14 = vsel %vm78_vm0, %v16_v12, 0.0  ;;  %v1098_v15 = vsel %vm78_vm0, %v26_v13, 0.0  ;;  %v36_v16 = vld [vmem:[%s1445_s0 + $0x2c] sm:$0x3]  ;;  %v17_v17 = vld [vmem:[%s1445_s0 + $0x6] sm:$0x3] }
  0x16   :  { %v1107_v18 = vsel %vm78_vm0, %v36_v16, 0.0  ;;  %v1110_v19 = vsel %vm78_vm0, %v17_v17, 0.0  ;;  %v27_v20 = vld [vmem:[%s1445_s0 + $0x1a] sm:$0x3]  ;;  %v37_v21 = vld [vmem:[%s1445_s0 + $0x2e] sm:$0x3] }
  0x17   :  { %263 = vadd.xlane.f32.xlu1 %v262_v28  ;;  %233 = vadd.xlane.f32.xlu0 %v232_v29  ;;  %v1119_v22 = vsel %vm78_vm0, %v27_v20, 0.0  ;;  %v1122_v23 = vsel %vm78_vm0, %v37_v21, 0.0  ;;  %v18_v24 = vld [vmem:[%s1445_s0 + $0x8] sm:$0x3]  ;;  %v28_v25 = vld [vmem:[%s1445_s0 + $0x1c] sm:$0x3] }
  0x18   :  { %v1133_v26 = vsel %vm78_vm0, %v18_v24, 0.0  ;;  %v1136_v27 = vsel %vm78_vm0, %v28_v25, 0.0  ;;  %v19_v28 = vld [vmem:[%s1445_s0 + $0xa] sm:$0x3]  ;;  %v29_v29 = vld [vmem:[%s1445_s0 + $0x1e] sm:$0x3] }
  0x19   :  { %v67_v36 = vld [vmem:[%s1445_s0 + $0x6a] sm:$0x3]  ;;  %v77_v37 = vld [vmem:[%s1445_s0 + $0x7e] sm:$0x3]  ;;  %v48_v48 = vld [vmem:[%s1445_s0 + $0x44] sm:$0x3] }
  0x1a   :  { %v238_v44 = vsel %vm78_vm0, %v67_v36, 0.0  ;;  %v268_v45 = vsel %vm78_vm0, %v77_v37, 0.0  ;;  %v58_v49 = vld [vmem:[%s1445_s0 + $0x58] sm:$0x3]  ;;  %v181_v52 = vsel %vm78_vm0, %v48_v48, 0.0  ;;  %vm680_vm6 = vcmask 1045509  }
  0x1b   :  { %236 = vadd.xlane.f32.xlu1 %v235_v30  ;;  %206 = vadd.xlane.f32.xlu0 %v205_v31  ;;  %v1145_v30 = vsel %vm78_vm0, %v19_v28, 0.0  ;;  %v1148_v31 = vsel %vm78_vm0, %v29_v29, 0.0  ;;  %v38_v53 = vld [vmem:[%s1445_s0 + $0x30] sm:$0x3]  ;;  %v39_v60 = vld [vmem:[%s1445_s0 + $0x32] sm:$0x3] }
  0x1c   :  { %v151_v57 = vsel %vm78_vm0, %v38_v53, 0.0  ;;  %v49_v61 = vld [vmem:[%s1445_s0 + $0x46] sm:$0x3]  ;;  %v154_v0 = vsel %vm78_vm0, %v39_v60, 0.0  ;;  %v59_v4 = vld [vmem:[%s1445_s0 + $0x5a] sm:$0x3] }
  0x1d   :  { %v184_v1 = vsel %vm78_vm0, %v49_v61, 0.0  ;;  %v69_v5 = vld [vmem:[%s1445_s0 + $0x6e] sm:$0x3]  ;;  %v214_v8 = vsel %vm78_vm0, %v59_v4, 0.0  ;;  %v40_v12 = vld [vmem:[%s1445_s0 + $0x34] sm:$0x3] }
  0x1e   :  { %v244_v9 = vsel %vm78_vm0, %v69_v5, 0.0  ;;  %v50_v13 = vld [vmem:[%s1445_s0 + $0x48] sm:$0x3]  ;;  %v157_v16 = vsel %vm78_vm0, %v40_v12, 0.0  ;;  %v60_v20 = vld [vmem:[%s1445_s0 + $0x5c] sm:$0x3] }
  0x1f   :  { %266 = vadd.xlane.f32.xlu0 %v957_v32  ;;  %176 = vadd.xlane.f32.xlu1 %v960_v33  ;;  %v20_v32 = vld [vmem:[%s1445_s0 + $0xc] sm:$0x3]  ;;  %v21_v33 = vld [vmem:[%s1445_s0 + $0xe] sm:$0x3]  ;;  %v187_v17 = vsel %vm78_vm0, %v50_v13, 0.0  ;;  %v217_v24 = vsel %vm78_vm0, %v60_v20, 0.0 }
  0x20   :  { %v1163_v40 = vsel %vm78_vm0, %v20_v32, 0.0  ;;  %v1166_v41 = vsel %vm78_vm0, %v21_v33, 0.0  ;;  %v30_v21 = vld [vmem:[%s1445_s0 + $0x20] sm:$0x3]  ;;  %vm682_vm7 = vcmask 1046534   ;;  %vm684_vm8 = vcmask 1047559  }
  0x21   :  { %v127_v25 = vsel %vm78_vm0, %v30_v21, 0.0  ;;  %vm827_vm9 = vcmask 9216   ;;  %vm825_vm10 = vcmask 15360  }
  0x23   :  { %179 = vadd.xlane.f32.xlu0 %v963_v34  ;;  %209 = vadd.xlane.f32.xlu1 %v966_v35  ;;  %v211_v34 = vsel %vm78_vm0, %v58_v49, 0.0  ;;  %v68_v35 = vld [vmem:[%s1445_s0 + $0x6c] sm:$0x3] }
  0x24   :  { %v241_v56 = vsel %vm78_vm0, %v68_v35, 0.0 }
  0x27   :  { %239 = vadd.xlane.f32.xlu0 %v238_v44  ;;  %269 = vadd.xlane.f32.xlu1 %v268_v45 }
  0x2b   :  { %182 = vadd.xlane.f32.xlu0 %v181_v52  ;;  %212 = vadd.xlane.f32.xlu1 %v211_v34 }
  0x2f   :  { %242 = vadd.xlane.f32.xlu0 %v241_v56  ;;  %152 = vadd.xlane.f32.xlu1 %v151_v57 }
  0x33   :  { %155 = vadd.xlane.f32.xlu0 %v154_v0  ;;  %185 = vadd.xlane.f32.xlu1 %v184_v1 }
  0x37   :  { %215 = vadd.xlane.f32.xlu0 %v214_v8  ;;  %245 = vadd.xlane.f32.xlu1 %v244_v9 }
  0x3b   :  { %158 = vadd.xlane.f32.xlu0 %v157_v16  ;;  %188 = vadd.xlane.f32.xlu1 %v187_v17 }
  0x3f   :  { %218 = vadd.xlane.f32.xlu0 %v217_v24  ;;  %128 = vadd.xlane.f32.xlu1 %v127_v25 }
  0x43   :  { %131 = vadd.xlane.f32.xlu0 %v975_v38  ;;  %161 = vadd.xlane.f32.xlu1 %v978_v39 }
  0x47   :  { %191 = vadd.xlane.f32.xlu0 %v987_v42  ;;  %221 = vadd.xlane.f32.xlu1 %v990_v43  ;;  %v336_v42 = vld [vmem:[%s1446_s1] sm:$0xff] }
  0x48   :  { %861 = vmatprep.mubr.msk.f32.mxu0 %vm743_vm1, %v336_v42 }
  0x4b   :  { %134 = vadd.xlane.f32.xlu0 %v999_v46  ;;  %164 = vadd.xlane.f32.xlu1 %v1002_v47  ;;  %v867_v47 = vmov 0  }
  0x4c   :  { %866 = vset.pattern.permute.xlu1 %v867_v47  ;;  %865 = vset.pattern.permute.xlu0 %v867_v47 }
  0x4f   :  { %194 = vadd.xlane.f32.xlu0 %v1011_v50  ;;  %104 = vadd.xlane.f32.xlu1 %v1014_v51  ;;  %v339_v50 = vld [vmem:[%s1447_s2 + $0x8] sm:$0x3]  ;;  %v338_v51 = vld [vmem:[%s1447_s2] sm:$0xff] }
  0x53   :  { %107 = vadd.xlane.f32.xlu0 %v1023_v54  ;;  %137 = vadd.xlane.f32.xlu1 %v1026_v55 }
  0x57   :  { %167 = vadd.xlane.f32.xlu0 %v1035_v58  ;;  %197 = vadd.xlane.f32.xlu1 %v1038_v59 }
  0x5b   :  { %110 = vadd.xlane.f32.xlu0 %v1047_v62  ;;  %140 = vadd.xlane.f32.xlu1 %v1050_v63 }
  0x5f   :  { %170 = vadd.xlane.f32.xlu0 %v1059_v2  ;;  %80 = vadd.xlane.f32.xlu1 %v1062_v3  ;;  %v414_v2 = vlaneseq }
  0x63   :  { %83 = vadd.xlane.f32.xlu0 %v1071_v6  ;;  %113 = vadd.xlane.f32.xlu1 %v1074_v7  ;;  %v415_v7 = vand.u32 127, %v414_v2 }
  0x67   :  { %143 = vadd.xlane.f32.xlu0 %v1083_v10  ;;  %173 = vadd.xlane.f32.xlu1 %v1086_v11  ;;  %v417_v10 = vshrl.u32 %v414_v2, 7 }
  0x6b   :  { %86 = vadd.xlane.f32.xlu0 %v1095_v14  ;;  %116 = vadd.xlane.f32.xlu1 %v1098_v15 }
  0x6f   :  { %146 = vadd.xlane.f32.xlu0 %v1107_v18  ;;  %89 = vadd.xlane.f32.xlu1 %v1110_v19  ;;  %v1270_v18 = vsub.s32 %v415_v7, %v417_v10 }
  0x73   :  { %119 = vadd.xlane.f32.xlu0 %v1119_v22  ;;  %149 = vadd.xlane.f32.xlu1 %v1122_v23 }
  0x77   :  { %92 = vadd.xlane.f32.xlu0 %v1133_v26  ;;  %122 = vadd.xlane.f32.xlu1 %v1136_v27 }
  0x7b   :  { %95 = vadd.xlane.f32.xlu0 %v1145_v30  ;;  %125 = vadd.xlane.f32.xlu1 %v1148_v31 }
  0x7f   :  { %98 = vadd.xlane.f32.xlu0 %v1163_v40  ;;  %101 = vadd.xlane.f32.xlu1 %v1166_v41 }
  0x8c   :  { %v255_v38 = vpop.xlane.xlu1 %254  ;;  %v249_v39 = vpop.xlane.xlu0 %248 }
  0x8d   :  { %v328_v19 = vmul.f32 0.25, %v249_v39  ;;  %v330_v28 = vmul.f32 0.25, %v255_v38 }
  0x8f   :  { %v643_v30 = vrot.slane %v328_v19, %v1270_v18  ;;  %v651_v41 = vrot.slane %v330_v28, %v1270_v18 }
  0x90   :  { %v252_v43 = vpop.xlane.xlu0 %251  ;;  %v1255_v46 = vpop.xlane.xlu1 %224  ;;  %347 = vperm.xlu1 %866, %v339_v50  }
  0x91   :  { %v329_v15 = vmul.f32 0.25, %v252_v43  ;;  %v320_v13 = vmul.f32 0.25, %v1255_v46 }
  0x93   :  { %v647_v26 = vrot.slane %v329_v15, %v1270_v18  ;;  %v611_v42 = vrot.slane %v320_v13, %v1270_v18 }
  0x94   :  { %v228_v54 = vpop.xlane.xlu0 %227  ;;  %v258_v55 = vpop.xlane.xlu1 %257 }
  0x95   :  { %342 = vperm.xlu0 %865, %v338_v51   ;;  %v331_v27 = vmul.f32 0.25, %v258_v55  ;;  %v728_v37 = vsel %vm672_vm2, %v647_v26, %v643_v30  ;;  %v321_v5 = vmul.f32 0.25, %v228_v54 }
  0x96   :  { %v729_v48 = vsel %vm674_vm3, %v651_v41, %v728_v37 }
  0x97   :  { %v655_v40 = vrot.slane %v331_v27, %v1270_v18  ;;  %v615_v20 = vrot.slane %v321_v5, %v1270_v18 }
  0x98   :  { %v231_v58 = vpop.xlane.xlu0 %230  ;;  %v261_v59 = vpop.xlane.xlu1 %260 }
  0x99   :  { %v332_v29 = vmul.f32 0.25, %v261_v59  ;;  %v730_v35 = vsel %vm676_vm4, %v655_v40, %v729_v48  ;;  %v322_v8 = vmul.f32 0.25, %v231_v58  ;;  %v721_v50 = vsel %vm672_vm2, %v615_v20, %v611_v42 }
  0x9b   :  { %v659_v44 = vrot.slane %v332_v29, %v1270_v18  ;;  %v619_v24 = vrot.slane %v322_v8, %v1270_v18 }
  0x9c   :  { %v1264_v62 = vpop.xlane.xlu1 %203  ;;  %v1266_v63 = vpop.xlane.xlu0 %200 }
  0x9d   :  { %v731_v56 = vsel %vm678_vm5, %v659_v44, %v730_v35  ;;  %v722_v51 = vsel %vm674_vm3, %v619_v24, %v721_v50  ;;  %v312_v26 = vmul.f32 0.25, %v1266_v63 }
  0x9f   :  { %v579_v37 = vrot.slane %v312_v26, %v1270_v18 }
  0xa0   :  { %v264_v3 = vpop.xlane.xlu1 %263  ;;  %v234_v6 = vpop.xlane.xlu0 %233 }
  0xa1   :  { %v333_v31 = vmul.f32 0.25, %v264_v3  ;;  %v323_v16 = vmul.f32 0.25, %v234_v6 }
  0xa3   :  { %v663_v45 = vrot.slane %v333_v31, %v1270_v18  ;;  %v623_v43 = vrot.slane %v323_v16, %v1270_v18 }
  0xa4   :  { %v237_v11 = vpop.xlane.xlu1 %236  ;;  %v1268_v14 = vpop.xlane.xlu0 %206 }
  0xa5   :  { %v732_v60 = vsel %vm680_vm6, %v663_v45, %v731_v56  ;;  %v324_v17 = vmul.f32 0.25, %v237_v11  ;;  %v723_v59 = vsel %vm676_vm4, %v623_v43, %v722_v51  ;;  %v314_v27 = vmul.f32 0.25, %v1268_v14 }
  0xa7   :  { %v627_v47 = vrot.slane %v324_v17, %v1270_v18  ;;  %v587_v41 = vrot.slane %v314_v27, %v1270_v18 }
  0xa8   :  { %v267_v22 = vpop.xlane.xlu0 %266  ;;  %v1272_v23 = vpop.xlane.xlu1 %176 }
  0xa9   :  { %v334_v32 = vmul.f32 0.25, %v267_v22  ;;  %v724_v3 = vsel %vm678_vm5, %v627_v47, %v723_v59  ;;  %v313_v22 = vmul.f32 0.25, %v1264_v62  ;;  %v304_v20 = vmul.f32 0.25, %v1272_v23 }
  0xab   :  { %v667_v49 = vrot.slane %v334_v32, %v1270_v18  ;;  %v583_v32 = vrot.slane %v313_v22, %v1270_v18 }
  0xac   :  { %v1276_v33 = vpop.xlane.xlu0 %179  ;;  %v1278_v36 = vpop.xlane.xlu1 %209 }
  0xad   :  { %v733_v1 = vsel %vm682_vm7, %v667_v49, %v732_v60  ;;  %v315_v30 = vmul.f32 0.25, %v1278_v36  ;;  %v714_v48 = vsel %vm672_vm2, %v583_v32, %v579_v37 }
  0xae   :  { %v715_v49 = vsel %vm674_vm3, %v587_v41, %v714_v48 }
  0xaf   :  { %v591_v45 = vrot.slane %v315_v30, %v1270_v18 }
  0xb0   :  { %v240_v52 = vpop.xlane.xlu0 %239  ;;  %v270_v34 = vpop.xlane.xlu1 %269 }
  0xb1   :  { %v335_v53 = vmul.f32 0.25, %v270_v34  ;;  %v325_v21 = vmul.f32 0.25, %v240_v52 }
  0xb3   :  { %v671_v57 = vrot.slane %v335_v53, %v1270_v18  ;;  %v631_v46 = vrot.slane %v325_v21, %v1270_v18  ;;  %v716_v53 = vsel %vm676_vm4, %v591_v45, %v715_v49 }
  0xb4   :  { %v1291_v61 = vpop.xlane.xlu0 %182  ;;  %v213_v0 = vpop.xlane.xlu1 %212 }
  0xb5   :  { %v734_v4 = vsel %vm684_vm8, %v671_v57, %v733_v1  ;;  %v725_v7 = vsel %vm680_vm6, %v631_v46, %v724_v3  ;;  %v316_v31 = vmul.f32 0.25, %v213_v0  ;;  %v306_v13 = vmul.f32 0.25, %v1291_v61 }
  0xb6   :  { %845 = vmatprep.subr.mxu0 %v734_v4 }
  0xb7   :  { %846 = vmatpush3.msra.mxu0 %v734_v4  ;;  %v595_v14 = vrot.slane %v316_v31, %v1270_v18  ;;  %v555_v43 = vrot.slane %v306_v13, %v1270_v18 }
  0xb8   :  { %v243_v9 = vpop.xlane.xlu0 %242  ;;  %v1295_v12 = vpop.xlane.xlu1 %152 }
  0xb9   :  { %v326_v25 = vmul.f32 0.25, %v243_v9  ;;  %v717_v57 = vsel %vm678_vm5, %v595_v14, %v716_v53  ;;  %v305_v9 = vmul.f32 0.25, %v1276_v33  ;;  %v547_v33 = vrot.slane %v304_v20, %v1270_v18 }
  0xba   :  { %v296_v32 = vmul.f32 0.25, %v1295_v12 }
  0xbb   :  { %v635_v54 = vrot.slane %v326_v25, %v1270_v18  ;;  %v551_v25 = vrot.slane %v305_v9, %v1270_v18 }
  0xbc   :  { %v1300_v38 = vpop.xlane.xlu0 %155  ;;  %v186_v39 = vpop.xlane.xlu1 %185 }
  0xbd   :  { %v726_v15 = vsel %vm682_vm7, %v635_v54, %v725_v7  ;;  %v307_v21 = vmul.f32 0.25, %v186_v39  ;;  %v707_v54 = vsel %vm672_vm2, %v551_v25, %v547_v33  ;;  %v297_v27 = vmul.f32 0.25, %v1300_v38 }
  0xbe   :  { %v708_v39 = vsel %vm674_vm3, %v555_v43, %v707_v54  ;;  %v515_v38 = vrot.slane %v296_v32, %v1270_v18 }
  0xbf   :  { %v559_v61 = vrot.slane %v307_v21, %v1270_v18  ;;  %v519_v41 = vrot.slane %v297_v27, %v1270_v18 }
  0xc0   :  { %v216_v55 = vpop.xlane.xlu0 %215  ;;  %v246_v58 = vpop.xlane.xlu1 %245 }
  0xc1   :  { %v327_v2 = vmul.f32 0.25, %v246_v58  ;;  %v317_v40 = vmul.f32 0.25, %v216_v55 }
  0xc3   :  { %v639_v6 = vrot.slane %v327_v2, %v1270_v18  ;;  %v599_v36 = vrot.slane %v317_v40, %v1270_v18  ;;  %v709_v2 = vsel %vm676_vm4, %v559_v61, %v708_v39 }
  0xc4   :  { %v1313_v10 = vpop.xlane.xlu0 %158  ;;  %v189_v11 = vpop.xlane.xlu1 %188 }
  0xc5   :  { %v727_v19 = vsel %vm684_vm8, %v639_v6, %v726_v15  ;;  %v718_v0 = vsel %vm680_vm6, %v599_v36, %v717_v57  ;;  %v308_v24 = vmul.f32 0.25, %v189_v11 }
  0xc6   :  { %847 = vmatprep.subr.mxu0 %v727_v19 }
  0xc7   :  { %848 = vmatpush3.msra.mxu0 %v727_v19  ;;  %v563_v51 = vrot.slane %v308_v24, %v1270_v18 }
  0xc8   :  { %v219_v28 = vpop.xlane.xlu0 %218  ;;  %v1320_v29 = vpop.xlane.xlu1 %128 }
  0xc9   :  { %v318_v44 = vmul.f32 0.25, %v219_v28  ;;  %v710_v6 = vsel %vm678_vm5, %v563_v51, %v709_v2  ;;  %v298_v28 = vmul.f32 0.25, %v1313_v10  ;;  %v288_v20 = vmul.f32 0.25, %v1320_v29 }
  0xcb   :  { %v603_v52 = vrot.slane %v318_v44, %v1270_v18  ;;  %v523_v45 = vrot.slane %v298_v28, %v1270_v18 }
  0xcc   :  { %v1326_v62 = vpop.xlane.xlu0 %131  ;;  %v162_v63 = vpop.xlane.xlu1 %161 }
  0xcd   :  { %v719_v5 = vsel %vm682_vm7, %v603_v52, %v718_v0  ;;  %v299_v37 = vmul.f32 0.25, %v162_v63  ;;  %v700_v52 = vsel %vm672_vm2, %v519_v41, %v515_v38  ;;  %v289_v0 = vmul.f32 0.25, %v1326_v62 }
  0xce   :  { %v701_v63 = vsel %vm674_vm3, %v523_v45, %v700_v52 }
  0xcf   :  { %v527_v49 = vrot.slane %v299_v37, %v1270_v18 }
  0xd0   :  { %v192_v34 = vpop.xlane.xlu0 %191  ;;  %v222_v35 = vpop.xlane.xlu1 %221 }
  0xd1   :  { %v319_v56 = vmul.f32 0.25, %v222_v35  ;;  %v309_v42 = vmul.f32 0.25, %v192_v34 }
  0xd3   :  { %v607_v60 = vrot.slane %v319_v56, %v1270_v18  ;;  %v567_v23 = vrot.slane %v309_v42, %v1270_v18  ;;  %v702_v56 = vsel %vm676_vm4, %v527_v49, %v701_v63  ;;  %v487_v42 = vrot.slane %v289_v0, %v1270_v18 }
  0xd4   :  { %v1338_v1 = vpop.xlane.xlu0 %134  ;;  %v165_v4 = vpop.xlane.xlu1 %164 }
  0xd5   :  { %v720_v8 = vsel %vm684_vm8, %v607_v60, %v719_v5  ;;  %v711_v11 = vsel %vm680_vm6, %v567_v23, %v710_v6  ;;  %v300_v40 = vmul.f32 0.25, %v165_v4 }
  0xd6   :  { %849 = vmatprep.subr.mxu0 %v720_v8 }
  0xd7   :  { %850 = vmatpush3.msra.mxu0 %v720_v8  ;;  %v531_v10 = vrot.slane %v300_v40, %v1270_v18  ;;  %v290_v8 = vmul.f32 0.25, %v1338_v1  ;;  %v483_v1 = vrot.slane %v288_v20, %v1270_v18 }
  0xd8   :  { %v195_v16 = vpop.xlane.xlu0 %194  ;;  %v1344_v17 = vpop.xlane.xlu1 %104 }
  0xd9   :  { %v310_v47 = vmul.f32 0.25, %v195_v16  ;;  %v703_v60 = vsel %vm678_vm5, %v531_v10, %v702_v56  ;;  %v491_v43 = vrot.slane %v290_v8, %v1270_v18 }
  0xdb   :  { %v571_v55 = vrot.slane %v310_v47, %v1270_v18 }
  0xdc   :  { %v1349_v50 = vpop.xlane.xlu0 %107  ;;  %v138_v46 = vpop.xlane.xlu1 %137 }
  0xdd   :  { %v712_v22 = vsel %vm682_vm7, %v571_v55, %v711_v11  ;;  %v291_v21 = vmul.f32 0.25, %v138_v46  ;;  %v693_v46 = vsel %vm672_vm2, %v487_v42, %v483_v1  ;;  %v281_v54 = vmul.f32 0.25, %v1349_v50 }
  0xde   :  { %v694_v39 = vsel %vm674_vm3, %v491_v43, %v693_v46  ;;  %v280_v55 = vmul.f32 0.25, %v1344_v17 }
  0xdf   :  { %v495_v61 = vrot.slane %v291_v21, %v1270_v18  ;;  %v455_v50 = vrot.slane %v281_v54, %v1270_v18 }
  0xe0   :  { %v168_v58 = vpop.xlane.xlu0 %167  ;;  %v198_v59 = vpop.xlane.xlu1 %197  ;;  %v451_v17 = vrot.slane %v280_v55, %v1270_v18 }
  0xe1   :  { %v311_v3 = vmul.f32 0.25, %v198_v59  ;;  %v301_v44 = vmul.f32 0.25, %v168_v58  ;;  %v695_v6 = vsel %vm676_vm4, %v495_v61, %v694_v39 }
  0xe2   :  { %v686_v10 = vsel %vm672_vm2, %v455_v50, %v451_v17 }
  0xe3   :  { %v575_v7 = vrot.slane %v311_v3, %v1270_v18  ;;  %v535_v12 = vrot.slane %v301_v44, %v1270_v18 }
  0xe4   :  { %v111_v15 = vpop.xlane.xlu0 %110  ;;  %v141_v19 = vpop.xlane.xlu1 %140 }
  0xe5   :  { %v713_v26 = vsel %vm684_vm8, %v575_v7, %v712_v22  ;;  %v704_v5 = vsel %vm680_vm6, %v535_v12, %v703_v60  ;;  %v292_v25 = vmul.f32 0.25, %v141_v19  ;;  %v282_v58 = vmul.f32 0.25, %v111_v15 }
  0xe6   :  { %851 = vmatprep.subr.mxu0 %v713_v26 }
  0xe7   :  { %852 = vmatpush3.msra.mxu0 %v713_v26  ;;  %v499_v29 = vrot.slane %v292_v25, %v1270_v18  ;;  %v459_v15 = vrot.slane %v282_v58, %v1270_v18 }
  0xe8   :  { %v171_v30 = vpop.xlane.xlu0 %170  ;;  %v1366_v31 = vpop.xlane.xlu1 %80 }
  0xe9   :  { %v302_v14 = vmul.f32 0.25, %v171_v30  ;;  %v696_v19 = vsel %vm678_vm5, %v499_v29, %v695_v6  ;;  %v687_v12 = vsel %vm674_vm3, %v459_v15, %v686_v10 }
  0xeb   :  { %v539_v34 = vrot.slane %v302_v14, %v1270_v18 }
  0xec   :  { %v84_v48 = vpop.xlane.xlu0 %83  ;;  %v114_v36 = vpop.xlane.xlu1 %113 }
  0xed   :  { %v705_v16 = vsel %vm682_vm7, %v539_v34, %v704_v5  ;;  %v283_v7 = vmul.f32 0.25, %v114_v36  ;;  %v273_v30 = vmul.f32 0.25, %v84_v48  ;;  %v272_v36 = vmul.f32 0.25, %v1366_v31 }
  0xef   :  { %v463_v41 = vrot.slane %v283_v7, %v1270_v18  ;;  %v423_v63 = vrot.slane %v273_v30, %v1270_v18  ;;  %v419_v0 = vrot.slane %v272_v36, %v1270_v18 }
  0xf0   :  { %v144_v35 = vpop.xlane.xlu0 %143  ;;  %v174_v53 = vpop.xlane.xlu1 %173 }
  0xf1   :  { %v303_v57 = vmul.f32 0.25, %v174_v53  ;;  %v293_v62 = vmul.f32 0.25, %v144_v35  ;;  %v688_v31 = vsel %vm676_vm4, %v463_v41, %v687_v12 }
  0xf3   :  { %v543_v4 = vrot.slane %v303_v57, %v1270_v18  ;;  %v503_v23 = vrot.slane %v293_v62, %v1270_v18 }
  0xf4   :  { %v87_v9 = vpop.xlane.xlu0 %86  ;;  %v117_v13 = vpop.xlane.xlu1 %116 }
  0xf5   :  { %v706_v24 = vsel %vm684_vm8, %v543_v4, %v705_v16  ;;  %v284_v22 = vmul.f32 0.25, %v117_v13  ;;  %v697_v28 = vsel %vm680_vm6, %v503_v23, %v696_v19  ;;  %v274_v44 = vmul.f32 0.25, %v87_v9  ;;  %v337_v23 = vld [vmem:[%s1446_s1 + $0x8] sm:$0x3] }
  0xf6   :  { %853 = vmatprep.subr.mxu0 %v706_v24  ;;  %v673_v16 = vsel %vm672_vm2, %v423_v63, %v419_v0 }
  0xf7   :  { %854 = vmatpush3.msra.mxu0 %v706_v24  ;;  %v467_v38 = vrot.slane %v284_v22, %v1270_v18  ;;  %v427_v56 = vrot.slane %v274_v44, %v1270_v18 }
  0xf8   :  { %v147_v47 = vpop.xlane.xlu0 %146  ;;  %v90_v33 = vpop.xlane.xlu1 %89 }
  0xf9   :  { %v294_v51 = vmul.f32 0.25, %v147_v47  ;;  %v275_v49 = vmul.f32 0.25, %v90_v33  ;;  %v689_v4 = vsel %vm678_vm5, %v467_v38, %v688_v31  ;;  %v675_v42 = vsel %vm674_vm3, %v427_v56, %v673_v16 }
  0xfb   :  { %v507_v59 = vrot.slane %v294_v51, %v1270_v18  ;;  %v431_v5 = vrot.slane %v275_v49, %v1270_v18 }
  0xfc   :  { %v120_v2 = vpop.xlane.xlu0 %119  ;;  %v150_v3 = vpop.xlane.xlu1 %149 }
  0xfd   :  { %v295_v11 = vmul.f32 0.25, %v150_v3  ;;  %v285_v26 = vmul.f32 0.25, %v120_v2  ;;  %v698_v40 = vsel %vm682_vm7, %v507_v59, %v697_v28  ;;  %v677_v33 = vsel %vm676_vm4, %v431_v5, %v675_v42 }
  0xff   :  { %v511_v27 = vrot.slane %v295_v11, %v1270_v18  ;;  %v471_v48 = vrot.slane %v285_v26, %v1270_v18 }
 0x100   :  { %v93_v32 = vpop.xlane.xlu0 %92  ;;  %v123_v37 = vpop.xlane.xlu1 %122 }
 0x101   :  { %v286_v45 = vmul.f32 0.25, %v123_v37  ;;  %v699_v14 = vsel %vm684_vm8, %v511_v27, %v698_v40  ;;  %v276_v52 = vmul.f32 0.25, %v93_v32  ;;  %v690_v13 = vsel %vm680_vm6, %v471_v48, %v689_v4 }
 0x102   :  { %855 = vmatprep.subr.mxu0 %v699_v14 }
 0x103   :  { %856 = vmatpush3.msra.mxu0 %v699_v14  ;;  %v475_v34 = vrot.slane %v286_v45, %v1270_v18  ;;  %v435_v8 = vrot.slane %v276_v52, %v1270_v18 }
 0x104   :  { %v96_v35 = vpop.xlane.xlu0 %95  ;;  %v126_v53 = vpop.xlane.xlu1 %125 }
 0x105   :  { %v277_v57 = vmul.f32 0.25, %v96_v35  ;;  %v287_v60 = vmul.f32 0.25, %v126_v53  ;;  %v691_v25 = vsel %vm682_vm7, %v475_v34, %v690_v13  ;;  %v679_v1 = vsel %vm678_vm5, %v435_v8, %v677_v33 }
 0x107   :  { %v479_v9 = vrot.slane %v287_v60, %v1270_v18  ;;  %v439_v20 = vrot.slane %v277_v57, %v1270_v18 }
 0x108   :  { %v99_v21 = vpop.xlane.xlu0 %98  ;;  %v102_v24 = vpop.xlane.xlu1 %101 }
 0x109   :  { %v278_v62 = vmul.f32 0.25, %v99_v21  ;;  %v279_v43 = vmul.f32 0.25, %v102_v24  ;;  %v692_v47 = vsel %vm684_vm8, %v479_v9, %v691_v25  ;;  %v681_v29 = vsel %vm680_vm6, %v439_v20, %v679_v1 }
 0x10a   :  { %857 = vmatprep.subr.mxu0 %v692_v47 }
 0x10b   :  { %v443_v61 = vrot.slane %v278_v62, %v1270_v18  ;;  %v447_v51 = vrot.slane %v279_v43, %v1270_v18  ;;  %858 = vmatpush3.msra.mxu0 %v692_v47 }
 0x10c   :  { %v348_v39 = vpop.permute.xlu1 %347 }
 0x10d   :  { %v683_v46 = vsel %vm682_vm7, %v443_v61, %v681_v29 }
 0x10e   :  { %v685_v54 = vsel %vm684_vm8, %v447_v51, %v683_v46 }
 0x10f   :  { %859 = vmatprep.subr.mxu0 %v685_v54 }
 0x110   :  { %860 = vmatpush3.msra.mxu0 %v685_v54  ;;  %v343_v58 = vpop.permute.xlu0 %342 }
 0x111   :  { %862 = vmatmul.mubr.msk.f32.vlgmr.msra.gmra.mxu0 %vm743_vm1, %v337_v23 }
 0x1d1   :  { %v863_v55 = vpop.f32.mrf.mxu0 }
 0x1d2   :  { %v822_v18 = vadd.f32 %v863_v55, %v348_v39 }
 0x1d3   :  { %v816_v59 = vpop.f32.mrf.mxu0 }
 0x1d4   :  { %828 = vst.msk [vmem:[%s1448_s3 + $0x8] sm:$0x3] %vm827_vm9, %v822_v18  ;;  %v817_v2 = vadd.f32 %v816_v59, %v343_v58 }
 0x1d6   :  { %826 = vst.msk [vmem:[%s1448_s3] sm:$0xff] %vm825_vm10, %v817_v2 }

</bundles_post_ra>
